<compile_context>
chip_gen: v6e
topology: v6e:2x2x1
jax: 0.10.0
libtpu: 0.0.40
codegen_flags: <defaults>
</compile_context>

<pallas_src>
import functools

import jax
import jax.numpy as jnp
import numpy as np
from jax import lax
from jax.experimental import pallas as pl
from jax.experimental.pallas import tpu as pltpu


def _encoder_block_kernel(xph_ref, w1a_ref, wsk_ref, w1b_ref, w2a_ref,
                          w2b_ref, bias_ref, out_ref, s0, s1, s2,
                          *, ho, wo):
    """Fused EncoderBlock for one batch element (whole image VMEM-resident).

    xph_ref : (1, 4*(ho+1), wo+1, cin)  4 stride-2 phase planes of the padded
              input, stacked along rows; phase p occupies rows
              [p*(ho+1), (p+1)*(ho+1)) and holds xpad[p//2::2, p%2::2, :].
    w1a_ref : (9*cin, cout)   block1 conv-a 3x3 stride-2, im2col form (BN folded)
    wsk_ref : (cin, cout)     1x1 stride-2 shortcut conv (BN folded)
    w1b_ref : (9*cout, cout)  block1 conv-b 3x3 stride-1, im2col form (BN folded)
    w2a_ref : (9*cout, cout)  block2 conv-a, im2col form (BN folded)
    w2b_ref : (9*cout, cout)  block2 conv-b, im2col form (BN folded)
    bias_ref: (5, cout)       folded BN shifts: [b1a, skip, b1b, b2a, b2b]
    out_ref : (1, ho, wo, cout)
    s0/s1/s2: (ho+2, wo+2, cout) f32 scratch holding zero-padded intermediates
              (b1a, res1, b2a) so they never leave VMEM.
    """
    hp1 = ho + 1

    # Zero the padded scratch buffers every grid step (borders must be zero
    # for the stride-1 "same"-padding convs; interiors are overwritten below).
    # Cheap relative to the 5 convs and megacore-safe under "parallel" grid.
    s0[...] = jnp.zeros_like(s0)
    s1[...] = jnp.zeros_like(s1)
    s2[...] = jnp.zeros_like(s2)

    xph = xph_ref[0]                                    # (4*hp1, wp1, cin)
    phases = [xph[p * hp1:(p + 1) * hp1] for p in range(4)]

    def conv3x3(get_patch, w_ref, bias):
        # im2col: gather the 9 taps along channels -> ONE MXU matmul (K = 9*C).
        patches = jnp.concatenate(
            [get_patch(dy, dx) for dy in range(3) for dx in range(3)], axis=-1)
        return jnp.einsum("hwk,ko->hwo", patches, w_ref[...],
                          preferred_element_type=jnp.float32) + bias

    # ---- block1 conv-a: 3x3 stride-2 via phase decomposition, +BN +ReLU ----
    def phase_patch(dy, dx):
        # tap (dy,dx) of the stride-2 conv reads xpad[2i+dy, 2j+dx], i.e. the
        # (dy%2, dx%2) phase plane shifted by (dy//2, dx//2) — unit stride.
        ph = phases[(dy % 2) * 2 + (dx % 2)]
        return ph[dy // 2:dy // 2 + ho, dx // 2:dx // 2 + wo, :]

    b1a = jnp.maximum(conv3x3(phase_patch, w1a_ref, bias_ref[0]), 0.0)
    s0[pl.ds(1, ho), pl.ds(1, wo), :] = b1a

    # ---- shortcut: 1x1 stride-2 conv + BN (no activation) ----
    x_sub = phases[3][:ho, :wo, :]                      # == x[::2, ::2, :]
    skip = jnp.einsum("hwi,io->hwo", x_sub, wsk_ref[...],
                      preferred_element_type=jnp.float32) + bias_ref[1]

    # ---- block1 conv-b + shortcut add + ReLU -> res1 ----
    s0v = s0[...]
    res1 = jnp.maximum(
        conv3x3(lambda dy, dx: s0v[dy:dy + ho, dx:dx + wo, :],
                w1b_ref, bias_ref[2]) + skip, 0.0)
    s1[pl.ds(1, ho), pl.ds(1, wo), :] = res1

    # ---- block2 conv-a + ReLU ----
    s1v = s1[...]
    b2a = jnp.maximum(
        conv3x3(lambda dy, dx: s1v[dy:dy + ho, dx:dx + wo, :],
                w2a_ref, bias_ref[3]), 0.0)
    s2[pl.ds(1, ho), pl.ds(1, wo), :] = b2a

    # ---- block2 conv-b + residual add + ReLU -> out ----
    s2v = s2[...]
    res2 = jnp.maximum(
        conv3x3(lambda dy, dx: s2v[dy:dy + ho, dx:dx + wo, :],
                w2b_ref, bias_ref[4]) + res1, 0.0)
    out_ref[0] = res2.astype(out_ref.dtype)


def _fold_bn_3x3(w, gamma, beta, mean, var, eps):
    """Fold eval-mode BN into a 3x3 conv: returns (9*Cin, Cout) im2col taps + shift.

    Row ordering is (dy*3 + dx)*Cin + ci, matching the kernel's tap concat.
    """
    co, ci = w.shape[0], w.shape[1]
    scale = gamma / jnp.sqrt(var + eps)                 # (Cout,)
    w_f = w * scale[:, None, None, None]                # (Cout, Cin, 3, 3)
    wmat = jnp.transpose(w_f, (2, 3, 1, 0)).reshape(9 * ci, co)
    return wmat, beta - mean * scale


def _fold_bn_1x1(w, gamma, beta, mean, var, eps):
    """Fold eval-mode BN into a 1x1 conv: returns (Cin, Cout) + shift."""
    scale = gamma / jnp.sqrt(var + eps)
    w_f = w[:, :, 0, 0] * scale[:, None]                # (Cout, Cin)
    return jnp.transpose(w_f), beta - mean * scale


def _fold(p, fold_fn, eps):
    return fold_fn(p["w"], p["gamma"], p["beta"], p["mean"], p["var"], eps)


def encoder_block_forward(x_nchw, params, *, eps=1e-5):
    n, cin, h, w = x_nchw.shape
    assert h % 2 == 0 and w % 2 == 0, "even spatial dims expected"
    cout = params["b1a"]["w"].shape[0]
    ho, wo = h // 2, w // 2
    hp1, wp1 = ho + 1, wo + 1

    # --- glue: NCHW -> NHWC, pad by 1, split into 4 stride-2 phase planes ---
    x = jnp.transpose(x_nchw, (0, 2, 3, 1))
    xpad = jnp.pad(x, ((0, 0), (1, 1), (1, 1), (0, 0)))
    phases = jnp.stack([xpad[:, rp::2, cp::2, :]
                        for rp in (0, 1) for cp in (0, 1)], axis=1)
    xph = phases.reshape(n, 4 * hp1, wp1, cin)          # (N, 4*hp1, wp1, Cin)

    # --- fold BN (eval mode) into every conv, pre-reshape to matmul form ---
    w1a, b1a = _fold(params["b1a"], _fold_bn_3x3, eps)   # (9*Cin, Cout)
    wsk, bsk = _fold(params["skip"], _fold_bn_1x1, eps)  # (Cin, Cout)
    w1b, b1b = _fold(params["b1b"], _fold_bn_3x3, eps)   # (9*Cout, Cout)
    w2a, b2a = _fold(params["b2a"], _fold_bn_3x3, eps)
    w2b, b2b = _fold(params["b2b"], _fold_bn_3x3, eps)
    bias = jnp.stack([b1a, bsk, b1b, b2a, b2b], axis=0)  # (5, Cout)

    kernel = functools.partial(_encoder_block_kernel, ho=ho, wo=wo)
    out_nhwc = pl.pallas_call(
        kernel,
        out_shape=jax.ShapeDtypeStruct((n, ho, wo, cout), x.dtype),
        grid_spec=pltpu.PrefetchScalarGridSpec(
            num_scalar_prefetch=0,
            grid=(n,),
            in_specs=[
                pl.BlockSpec((1, 4 * hp1, wp1, cin), lambda i: (i, 0, 0, 0)),
                pl.BlockSpec((9 * cin, cout), lambda i: (0, 0)),
                pl.BlockSpec((cin, cout), lambda i: (0, 0)),
                pl.BlockSpec((9 * cout, cout), lambda i: (0, 0)),
                pl.BlockSpec((9 * cout, cout), lambda i: (0, 0)),
                pl.BlockSpec((9 * cout, cout), lambda i: (0, 0)),
                pl.BlockSpec((5, cout), lambda i: (0, 0)),
            ],
            out_specs=pl.BlockSpec((1, ho, wo, cout), lambda i: (i, 0, 0, 0)),
            scratch_shapes=[pltpu.VMEM((ho + 2, wo + 2, cout), jnp.float32)
                            for _ in range(3)],
        ),
        compiler_params=pltpu.CompilerParams(
            dimension_semantics=("parallel",)),
    )(xph, w1a, wsk, w1b, w2a, w2b, bias)

    return jnp.transpose(out_nhwc, (0, 3, 1, 2))        # back to NCHW


# ------------------------- pure-JAX reference ------------------------------
def _conv_bn_act(x, p, *, stride, padding, relu, eps):
    y = lax.conv_general_dilated(
        x, p["w"], (stride, stride), [(padding, padding), (padding, padding)],
        dimension_numbers=("NCHW", "OIHW", "NCHW"))
    co = p["w"].shape[0]
    scale = (p["gamma"] / jnp.sqrt(p["var"] + eps)).reshape(1, co, 1, 1)
    y = (y - p["mean"].reshape(1, co, 1, 1)) * scale + p["beta"].reshape(1, co, 1, 1)
    return jnp.maximum(y, 0.0) if relu else y


def _reference(x, params, *, eps=1e-5):
    res1 = _conv_bn_act(x, params["b1a"], stride=2, padding=1, relu=True, eps=eps)
    res1 = _conv_bn_act(res1, params["b1b"], stride=1, padding=1, relu=False, eps=eps)
    sc = _conv_bn_act(x, params["skip"], stride=2, padding=0, relu=False, eps=eps)
    res1 = jnp.maximum(res1 + sc, 0.0)
    res2 = _conv_bn_act(res1, params["b2a"], stride=1, padding=1, relu=True, eps=eps)
    res2 = _conv_bn_act(res2, params["b2b"], stride=1, padding=1, relu=False, eps=eps)
    return jnp.maximum(res2 + res1, 0.0)


if __name__ == "__main__":
    key = jax.random.PRNGKey(0)
    N, CIN, COUT, H, W = 2, 4, 8, 16, 16

    def make_conv(k, ci, co, ksz):
        kw, kg, kb, km, kv = jax.random.split(k, 5)
        return dict(
            w=0.1 * jax.random.normal(kw, (co, ci, ksz, ksz), jnp.float32),
            gamma=1.0 + 0.1 * jax.random.normal(kg, (co,), jnp.float32),
            beta=0.1 * jax.random.normal(kb, (co,), jnp.float32),
            mean=0.1 * jax.random.normal(km, (co,), jnp.float32),
            var=0.5 + 0.5 * jax.random.uniform(kv, (co,), jnp.float32),
        )

    kx, k1, k2, k3, k4, k5 = jax.random.split(key, 6)
    x = jax.random.normal(kx, (N, CIN, H, W), jnp.float32)
    params = dict(
        b1a=make_conv(k1, CIN, COUT, 3),
        b1b=make_conv(k2, COUT, COUT, 3),
        skip=make_conv(k3, CIN, COUT, 1),
        b2a=make_conv(k4, COUT, COUT, 3),
        b2b=make_conv(k5, COUT, COUT, 3),
    )

    out = encoder_block_forward(x, params)
    out = jax.block_until_ready(out)

    ref = _reference(x, params)
    np.testing.assert_allclose(np.asarray(out), np.asarray(ref),
                               rtol=1e-3, atol=1e-4)
    assert out.shape == (N, COUT, H // 2, W // 2)
    print("KERNEL_OK")
</pallas_src>

<mosaic_0001>
module attributes {stable_mosaic.version = 11 : i64} {
  func.func @_encoder_block_kernel(%arg0: i32, %arg1: memref<1x36x9x4xf32, #tpu.memory_space<vmem>>, %arg2: memref<36x8xf32, #tpu.memory_space<vmem>>, %arg3: memref<4x8xf32, #tpu.memory_space<vmem>>, %arg4: memref<72x8xf32, #tpu.memory_space<vmem>>, %arg5: memref<72x8xf32, #tpu.memory_space<vmem>>, %arg6: memref<72x8xf32, #tpu.memory_space<vmem>>, %arg7: memref<5x8xf32, #tpu.memory_space<vmem>>, %arg8: memref<1x8x8x8xf32, #tpu.memory_space<vmem>>, %arg9: memref<10x10x8xf32, #tpu.memory_space<vmem>>, %arg10: memref<10x10x8xf32, #tpu.memory_space<vmem>>, %arg11: memref<10x10x8xf32, #tpu.memory_space<vmem>>) attributes {dimension_semantics = [#tpu.dimension_semantics<parallel>], iteration_bounds = array<i64: 2>, scalar_prefetch = 0 : i64, scratch_operands = 3 : i64, tpu.core_type = #tpu.core_type<tc>, window_params = [{transform_indices = @transform_0, window_bounds = array<i64: 1, 36, 9, 4>}, {pipeline_mode = #tpu.pipeline_mode<synchronous>, transform_indices = @transform_1, window_bounds = array<i64: 36, 8>}, {pipeline_mode = #tpu.pipeline_mode<synchronous>, transform_indices = @transform_2, window_bounds = array<i64: 4, 8>}, {pipeline_mode = #tpu.pipeline_mode<synchronous>, transform_indices = @transform_3, window_bounds = array<i64: 72, 8>}, {pipeline_mode = #tpu.pipeline_mode<synchronous>, transform_indices = @transform_4, window_bounds = array<i64: 72, 8>}, {pipeline_mode = #tpu.pipeline_mode<synchronous>, transform_indices = @transform_5, window_bounds = array<i64: 72, 8>}, {pipeline_mode = #tpu.pipeline_mode<synchronous>, transform_indices = @transform_6, window_bounds = array<i64: 5, 8>}, {transform_indices = @transform_7, window_bounds = array<i64: 1, 8, 8, 8>}]} {
    %cst = arith.constant 0.000000e+00 : f32
    %0 = vector.broadcast %cst : f32 to vector<10x10x8xf32>
    %c0 = arith.constant 0 : index
    %c0_0 = arith.constant 0 : index
    %c0_1 = arith.constant 0 : index
    %1 = vector.load %arg9[%c0, %c0_0, %c0_1] : memref<10x10x8xf32, #tpu.memory_space<vmem>>, vector<10x10x8xf32>
    tpu.vector_store %arg9[%c0, %c0_0, %c0_1], %0 {strides = array<i32>} : memref<10x10x8xf32, #tpu.memory_space<vmem>>, vector<10x10x8xf32>,
    %cst_2 = arith.constant 0.000000e+00 : f32
    %2 = vector.broadcast %cst_2 : f32 to vector<10x10x8xf32>
    %c0_3 = arith.constant 0 : index
    %c0_4 = arith.constant 0 : index
    %c0_5 = arith.constant 0 : index
    %3 = vector.load %arg10[%c0_3, %c0_4, %c0_5] : memref<10x10x8xf32, #tpu.memory_space<vmem>>, vector<10x10x8xf32>
    tpu.vector_store %arg10[%c0_3, %c0_4, %c0_5], %2 {strides = array<i32>} : memref<10x10x8xf32, #tpu.memory_space<vmem>>, vector<10x10x8xf32>,
    %cst_6 = arith.constant 0.000000e+00 : f32
    %4 = vector.broadcast %cst_6 : f32 to vector<10x10x8xf32>
    %c0_7 = arith.constant 0 : index
    %c0_8 = arith.constant 0 : index
    %c0_9 = arith.constant 0 : index
    %5 = vector.load %arg11[%c0_7, %c0_8, %c0_9] : memref<10x10x8xf32, #tpu.memory_space<vmem>>, vector<10x10x8xf32>
    tpu.vector_store %arg11[%c0_7, %c0_8, %c0_9], %4 {strides = array<i32>} : memref<10x10x8xf32, #tpu.memory_space<vmem>>, vector<10x10x8xf32>,
    %c0_10 = arith.constant 0 : index
    %c0_11 = arith.constant 0 : index
    %c0_12 = arith.constant 0 : index
    %c0_13 = arith.constant 0 : index
    %6 = vector.load %arg1[%c0_10, %c0_11, %c0_12, %c0_13] : memref<1x36x9x4xf32, #tpu.memory_space<vmem>>, vector<1x36x9x4xf32>
    %7 = vector.shape_cast %6 : vector<1x36x9x4xf32> to vector<36x9x4xf32>
    %8 = vector.extract_strided_slice %7 {offsets = [0, 0, 0], sizes = [9, 9, 4], strides = [1, 1, 1]} : vector<36x9x4xf32> to vector<9x9x4xf32>
    %9 = vector.extract_strided_slice %7 {offsets = [9, 0, 0], sizes = [9, 9, 4], strides = [1, 1, 1]} : vector<36x9x4xf32> to vector<9x9x4xf32>
    %10 = vector.extract_strided_slice %7 {offsets = [18, 0, 0], sizes = [9, 9, 4], strides = [1, 1, 1]} : vector<36x9x4xf32> to vector<9x9x4xf32>
    %11 = vector.extract_strided_slice %7 {offsets = [27, 0, 0], sizes = [9, 9, 4], strides = [1, 1, 1]} : vector<36x9x4xf32> to vector<9x9x4xf32>
    %c0_14 = arith.constant 0 : index
    %c0_15 = arith.constant 0 : index
    %12 = vector.load %arg7[%c0_14, %c0_15] : memref<5x8xf32, #tpu.memory_space<vmem>>, vector<1x8xf32>
    %13 = vector.shape_cast %12 : vector<1x8xf32> to vector<8xf32>
    %14 = vector.extract_strided_slice %8 {offsets = [0, 0, 0], sizes = [8, 8, 4], strides = [1, 1, 1]} : vector<9x9x4xf32> to vector<8x8x4xf32>
    %15 = vector.extract_strided_slice %9 {offsets = [0, 0, 0], sizes = [8, 8, 4], strides = [1, 1, 1]} : vector<9x9x4xf32> to vector<8x8x4xf32>
    %16 = vector.extract_strided_slice %8 {offsets = [0, 1, 0], sizes = [8, 8, 4], strides = [1, 1, 1]} : vector<9x9x4xf32> to vector<8x8x4xf32>
    %17 = vector.extract_strided_slice %10 {offsets = [0, 0, 0], sizes = [8, 8, 4], strides = [1, 1, 1]} : vector<9x9x4xf32> to vector<8x8x4xf32>
    %18 = vector.extract_strided_slice %11 {offsets = [0, 0, 0], sizes = [8, 8, 4], strides = [1, 1, 1]} : vector<9x9x4xf32> to vector<8x8x4xf32>
    %19 = vector.extract_strided_slice %10 {offsets = [0, 1, 0], sizes = [8, 8, 4], strides = [1, 1, 1]} : vector<9x9x4xf32> to vector<8x8x4xf32>
    %20 = vector.extract_strided_slice %8 {offsets = [1, 0, 0], sizes = [8, 8, 4], strides = [1, 1, 1]} : vector<9x9x4xf32> to vector<8x8x4xf32>
    %21 = vector.extract_strided_slice %9 {offsets = [1, 0, 0], sizes = [8, 8, 4], strides = [1, 1, 1]} : vector<9x9x4xf32> to vector<8x8x4xf32>
    %22 = vector.extract_strided_slice %8 {offsets = [1, 1, 0], sizes = [8, 8, 4], strides = [1, 1, 1]} : vector<9x9x4xf32> to vector<8x8x4xf32>
    %23 = tpu.concatenate %14, %15, %16, %17, %18, %19, %20, %21, %22 in 2 : vector<8x8x4xf32>, vector<8x8x4xf32>, vector<8x8x4xf32>, vector<8x8x4xf32>, vector<8x8x4xf32>, vector<8x8x4xf32>, vector<8x8x4xf32>, vector<8x8x4xf32>, vector<8x8x4xf32> -> vector<8x8x36xf32>
    %c0_16 = arith.constant 0 : index
    %c0_17 = arith.constant 0 : index
    %24 = vector.load %arg2[%c0_16, %c0_17] : memref<36x8xf32, #tpu.memory_space<vmem>>, vector<36x8xf32>
    "tpu.trace_start"() <{level = 10 : i32, message = "hwk,ko->hwo"}> : () -> ()
    %cst_18 = arith.constant dense<0.000000e+00> : vector<8x8x8xf32>
    %25 = tpu.matmul %23, %24, %cst_18 {dimension_numbers = #tpu.dot_dimension_numbers<[2], [0], [0, 1], [1], [0, 0, 0, 1, 1, 1], [], []>} : vector<8x8x36xf32>, vector<36x8xf32>, vector<8x8x8xf32> -> vector<8x8x8xf32>
    "tpu.trace_stop"() : () -> ()
    %26 = vector.shape_cast %13 : vector<8xf32> to vector<1x1x8xf32>
    %27 = vector.broadcast %26 : vector<1x1x8xf32> to vector<8x8x8xf32>
    %28 = arith.addf %25, %27 : vector<8x8x8xf32>
    %cst_19 = arith.constant 0.000000e+00 : f32
    %29 = vector.broadcast %cst_19 : f32 to vector<8x8x8xf32>
    %30 = arith.maximumf %28, %29 : vector<8x8x8xf32>
    %c1 = arith.constant 1 : index
    %c1_20 = arith.constant 1 : index
    %c0_21 = arith.constant 0 : index
    %31 = vector.load %arg9[%c1, %c1_20, %c0_21] : memref<10x10x8xf32, #tpu.memory_space<vmem>>, vector<8x8x8xf32>
    tpu.vector_store %arg9[%c1, %c1_20, %c0_21], %30 {strides = array<i32>} : memref<10x10x8xf32, #tpu.memory_space<vmem>>, vector<8x8x8xf32>,
    %32 = vector.extract_strided_slice %11 {offsets = [0, 0, 0], sizes = [8, 8, 4], strides = [1, 1, 1]} : vector<9x9x4xf32> to vector<8x8x4xf32>
    %c0_22 = arith.constant 0 : index
    %c0_23 = arith.constant 0 : index
    %33 = vector.load %arg3[%c0_22, %c0_23] : memref<4x8xf32, #tpu.memory_space<vmem>>, vector<4x8xf32>
    "tpu.trace_start"() <{level = 10 : i32, message = "hwi,io->hwo"}> : () -> ()
    %cst_24 = arith.constant dense<0.000000e+00> : vector<8x8x8xf32>
    %34 = tpu.matmul %32, %33, %cst_24 {dimension_numbers = #tpu.dot_dimension_numbers<[2], [0], [0, 1], [1], [0, 0, 0, 1, 1, 1], [], []>} : vector<8x8x4xf32>, vector<4x8xf32>, vector<8x8x8xf32> -> vector<8x8x8xf32>
    "tpu.trace_stop"() : () -> ()
    %c1_25 = arith.constant 1 : index
    %c0_26 = arith.constant 0 : index
    %35 = vector.load %arg7[%c1_25, %c0_26] : memref<5x8xf32, #tpu.memory_space<vmem>>, vector<1x8xf32>
    %36 = vector.shape_cast %35 : vector<1x8xf32> to vector<8xf32>
    %37 = vector.shape_cast %36 : vector<8xf32> to vector<1x1x8xf32>
    %38 = vector.broadcast %37 : vector<1x1x8xf32> to vector<8x8x8xf32>
    %39 = arith.addf %34, %38 : vector<8x8x8xf32>
    %c0_27 = arith.constant 0 : index
    %c0_28 = arith.constant 0 : index
    %c0_29 = arith.constant 0 : index
    %40 = vector.load %arg9[%c0_27, %c0_28, %c0_29] : memref<10x10x8xf32, #tpu.memory_space<vmem>>, vector<10x10x8xf32>
    %c2 = arith.constant 2 : index
    %c0_30 = arith.constant 0 : index
    %41 = vector.load %arg7[%c2, %c0_30] : memref<5x8xf32, #tpu.memory_space<vmem>>, vector<1x8xf32>
    %42 = vector.shape_cast %41 : vector<1x8xf32> to vector<8xf32>
    %43 = vector.extract_strided_slice %40 {offsets = [0, 0, 0], sizes = [8, 8, 8], strides = [1, 1, 1]} : vector<10x10x8xf32> to vector<8x8x8xf32>
    %44 = vector.extract_strided_slice %40 {offsets = [0, 1, 0], sizes = [8, 8, 8], strides = [1, 1, 1]} : vector<10x10x8xf32> to vector<8x8x8xf32>
    %45 = vector.extract_strided_slice %40 {offsets = [0, 2, 0], sizes = [8, 8, 8], strides = [1, 1, 1]} : vector<10x10x8xf32> to vector<8x8x8xf32>
    %46 = vector.extract_strided_slice %40 {offsets = [1, 0, 0], sizes = [8, 8, 8], strides = [1, 1, 1]} : vector<10x10x8xf32> to vector<8x8x8xf32>
    %47 = vector.extract_strided_slice %40 {offsets = [1, 1, 0], sizes = [8, 8, 8], strides = [1, 1, 1]} : vector<10x10x8xf32> to vector<8x8x8xf32>
    %48 = vector.extract_strided_slice %40 {offsets = [1, 2, 0], sizes = [8, 8, 8], strides = [1, 1, 1]} : vector<10x10x8xf32> to vector<8x8x8xf32>
    %49 = vector.extract_strided_slice %40 {offsets = [2, 0, 0], sizes = [8, 8, 8], strides = [1, 1, 1]} : vector<10x10x8xf32> to vector<8x8x8xf32>
    %50 = vector.extract_strided_slice %40 {offsets = [2, 1, 0], sizes = [8, 8, 8], strides = [1, 1, 1]} : vector<10x10x8xf32> to vector<8x8x8xf32>
    %51 = vector.extract_strided_slice %40 {offsets = [2, 2, 0], sizes = [8, 8, 8], strides = [1, 1, 1]} : vector<10x10x8xf32> to vector<8x8x8xf32>
    %52 = tpu.concatenate %43, %44, %45, %46, %47, %48, %49, %50, %51 in 2 : vector<8x8x8xf32>, vector<8x8x8xf32>, vector<8x8x8xf32>, vector<8x8x8xf32>, vector<8x8x8xf32>, vector<8x8x8xf32>, vector<8x8x8xf32>, vector<8x8x8xf32>, vector<8x8x8xf32> -> vector<8x8x72xf32>
    %c0_31 = arith.constant 0 : index
    %c0_32 = arith.constant 0 : index
    %53 = vector.load %arg4[%c0_31, %c0_32] : memref<72x8xf32, #tpu.memory_space<vmem>>, vector<72x8xf32>
    "tpu.trace_start"() <{level = 10 : i32, message = "hwk,ko->hwo"}> : () -> ()
    %cst_33 = arith.constant dense<0.000000e+00> : vector<8x8x8xf32>
    %54 = tpu.matmul %52, %53, %cst_33 {dimension_numbers = #tpu.dot_dimension_numbers<[2], [0], [0, 1], [1], [0, 0, 0, 1, 1, 1], [], []>} : vector<8x8x72xf32>, vector<72x8xf32>, vector<8x8x8xf32> -> vector<8x8x8xf32>
    "tpu.trace_stop"() : () -> ()
    %55 = vector.shape_cast %42 : vector<8xf32> to vector<1x1x8xf32>
    %56 = vector.broadcast %55 : vector<1x1x8xf32> to vector<8x8x8xf32>
    %57 = arith.addf %54, %56 : vector<8x8x8xf32>
    %58 = arith.addf %57, %39 : vector<8x8x8xf32>
    %cst_34 = arith.constant 0.000000e+00 : f32
    %59 = vector.broadcast %cst_34 : f32 to vector<8x8x8xf32>
    %60 = arith.maximumf %58, %59 : vector<8x8x8xf32>
    %c1_35 = arith.constant 1 : index
    %c1_36 = arith.constant 1 : index
    %c0_37 = arith.constant 0 : index
    %61 = vector.load %arg10[%c1_35, %c1_36, %c0_37] : memref<10x10x8xf32, #tpu.memory_space<vmem>>, vector<8x8x8xf32>
    tpu.vector_store %arg10[%c1_35, %c1_36, %c0_37], %60 {strides = array<i32>} : memref<10x10x8xf32, #tpu.memory_space<vmem>>, vector<8x8x8xf32>,
    %c0_38 = arith.constant 0 : index
    %c0_39 = arith.constant 0 : index
    %c0_40 = arith.constant 0 : index
    %62 = vector.load %arg10[%c0_38, %c0_39, %c0_40] : memref<10x10x8xf32, #tpu.memory_space<vmem>>, vector<10x10x8xf32>
    %c3 = arith.constant 3 : index
    %c0_41 = arith.constant 0 : index
    %63 = vector.load %arg7[%c3, %c0_41] : memref<5x8xf32, #tpu.memory_space<vmem>>, vector<1x8xf32>
    %64 = vector.shape_cast %63 : vector<1x8xf32> to vector<8xf32>
    %65 = vector.extract_strided_slice %62 {offsets = [0, 0, 0], sizes = [8, 8, 8], strides = [1, 1, 1]} : vector<10x10x8xf32> to vector<8x8x8xf32>
    %66 = vector.extract_strided_slice %62 {offsets = [0, 1, 0], sizes = [8, 8, 8], strides = [1, 1, 1]} : vector<10x10x8xf32> to vector<8x8x8xf32>
    %67 = vector.extract_strided_slice %62 {offsets = [0, 2, 0], sizes = [8, 8, 8], strides = [1, 1, 1]} : vector<10x10x8xf32> to vector<8x8x8xf32>
    %68 = vector.extract_strided_slice %62 {offsets = [1, 0, 0], sizes = [8, 8, 8], strides = [1, 1, 1]} : vector<10x10x8xf32> to vector<8x8x8xf32>
    %69 = vector.extract_strided_slice %62 {offsets = [1, 1, 0], sizes = [8, 8, 8], strides = [1, 1, 1]} : vector<10x10x8xf32> to vector<8x8x8xf32>
    %70 = vector.extract_strided_slice %62 {offsets = [1, 2, 0], sizes = [8, 8, 8], strides = [1, 1, 1]} : vector<10x10x8xf32> to vector<8x8x8xf32>
    %71 = vector.extract_strided_slice %62 {offsets = [2, 0, 0], sizes = [8, 8, 8], strides = [1, 1, 1]} : vector<10x10x8xf32> to vector<8x8x8xf32>
    %72 = vector.extract_strided_slice %62 {offsets = [2, 1, 0], sizes = [8, 8, 8], strides = [1, 1, 1]} : vector<10x10x8xf32> to vector<8x8x8xf32>
    %73 = vector.extract_strided_slice %62 {offsets = [2, 2, 0], sizes = [8, 8, 8], strides = [1, 1, 1]} : vector<10x10x8xf32> to vector<8x8x8xf32>
    %74 = tpu.concatenate %65, %66, %67, %68, %69, %70, %71, %72, %73 in 2 : vector<8x8x8xf32>, vector<8x8x8xf32>, vector<8x8x8xf32>, vector<8x8x8xf32>, vector<8x8x8xf32>, vector<8x8x8xf32>, vector<8x8x8xf32>, vector<8x8x8xf32>, vector<8x8x8xf32> -> vector<8x8x72xf32>
    %c0_42 = arith.constant 0 : index
    %c0_43 = arith.constant 0 : index
    %75 = vector.load %arg5[%c0_42, %c0_43] : memref<72x8xf32, #tpu.memory_space<vmem>>, vector<72x8xf32>
    "tpu.trace_start"() <{level = 10 : i32, message = "hwk,ko->hwo"}> : () -> ()
    %cst_44 = arith.constant dense<0.000000e+00> : vector<8x8x8xf32>
    %76 = tpu.matmul %74, %75, %cst_44 {dimension_numbers = #tpu.dot_dimension_numbers<[2], [0], [0, 1], [1], [0, 0, 0, 1, 1, 1], [], []>} : vector<8x8x72xf32>, vector<72x8xf32>, vector<8x8x8xf32> -> vector<8x8x8xf32>
    "tpu.trace_stop"() : () -> ()
    %77 = vector.shape_cast %64 : vector<8xf32> to vector<1x1x8xf32>
    %78 = vector.broadcast %77 : vector<1x1x8xf32> to vector<8x8x8xf32>
    %79 = arith.addf %76, %78 : vector<8x8x8xf32>
    %cst_45 = arith.constant 0.000000e+00 : f32
    %80 = vector.broadcast %cst_45 : f32 to vector<8x8x8xf32>
    %81 = arith.maximumf %79, %80 : vector<8x8x8xf32>
    %c1_46 = arith.constant 1 : index
    %c1_47 = arith.constant 1 : index
    %c0_48 = arith.constant 0 : index
    %82 = vector.load %arg11[%c1_46, %c1_47, %c0_48] : memref<10x10x8xf32, #tpu.memory_space<vmem>>, vector<8x8x8xf32>
    tpu.vector_store %arg11[%c1_46, %c1_47, %c0_48], %81 {strides = array<i32>} : memref<10x10x8xf32, #tpu.memory_space<vmem>>, vector<8x8x8xf32>,
    %c0_49 = arith.constant 0 : index
    %c0_50 = arith.constant 0 : index
    %c0_51 = arith.constant 0 : index
    %83 = vector.load %arg11[%c0_49, %c0_50, %c0_51] : memref<10x10x8xf32, #tpu.memory_space<vmem>>, vector<10x10x8xf32>
    %c4 = arith.constant 4 : index
    %c0_52 = arith.constant 0 : index
    %84 = vector.load %arg7[%c4, %c0_52] : memref<5x8xf32, #tpu.memory_space<vmem>>, vector<1x8xf32>
    %85 = vector.shape_cast %84 : vector<1x8xf32> to vector<8xf32>
    %86 = vector.extract_strided_slice %83 {offsets = [0, 0, 0], sizes = [8, 8, 8], strides = [1, 1, 1]} : vector<10x10x8xf32> to vector<8x8x8xf32>
    %87 = vector.extract_strided_slice %83 {offsets = [0, 1, 0], sizes = [8, 8, 8], strides = [1, 1, 1]} : vector<10x10x8xf32> to vector<8x8x8xf32>
    %88 = vector.extract_strided_slice %83 {offsets = [0, 2, 0], sizes = [8, 8, 8], strides = [1, 1, 1]} : vector<10x10x8xf32> to vector<8x8x8xf32>
    %89 = vector.extract_strided_slice %83 {offsets = [1, 0, 0], sizes = [8, 8, 8], strides = [1, 1, 1]} : vector<10x10x8xf32> to vector<8x8x8xf32>
    %90 = vector.extract_strided_slice %83 {offsets = [1, 1, 0], sizes = [8, 8, 8], strides = [1, 1, 1]} : vector<10x10x8xf32> to vector<8x8x8xf32>
    %91 = vector.extract_strided_slice %83 {offsets = [1, 2, 0], sizes = [8, 8, 8], strides = [1, 1, 1]} : vector<10x10x8xf32> to vector<8x8x8xf32>
    %92 = vector.extract_strided_slice %83 {offsets = [2, 0, 0], sizes = [8, 8, 8], strides = [1, 1, 1]} : vector<10x10x8xf32> to vector<8x8x8xf32>
    %93 = vector.extract_strided_slice %83 {offsets = [2, 1, 0], sizes = [8, 8, 8], strides = [1, 1, 1]} : vector<10x10x8xf32> to vector<8x8x8xf32>
    %94 = vector.extract_strided_slice %83 {offsets = [2, 2, 0], sizes = [8, 8, 8], strides = [1, 1, 1]} : vector<10x10x8xf32> to vector<8x8x8xf32>
    %95 = tpu.concatenate %86, %87, %88, %89, %90, %91, %92, %93, %94 in 2 : vector<8x8x8xf32>, vector<8x8x8xf32>, vector<8x8x8xf32>, vector<8x8x8xf32>, vector<8x8x8xf32>, vector<8x8x8xf32>, vector<8x8x8xf32>, vector<8x8x8xf32>, vector<8x8x8xf32> -> vector<8x8x72xf32>
    %c0_53 = arith.constant 0 : index
    %c0_54 = arith.constant 0 : index
    %96 = vector.load %arg6[%c0_53, %c0_54] : memref<72x8xf32, #tpu.memory_space<vmem>>, vector<72x8xf32>
    "tpu.trace_start"() <{level = 10 : i32, message = "hwk,ko->hwo"}> : () -> ()
    %cst_55 = arith.constant dense<0.000000e+00> : vector<8x8x8xf32>
    %97 = tpu.matmul %95, %96, %cst_55 {dimension_numbers = #tpu.dot_dimension_numbers<[2], [0], [0, 1], [1], [0, 0, 0, 1, 1, 1], [], []>} : vector<8x8x72xf32>, vector<72x8xf32>, vector<8x8x8xf32> -> vector<8x8x8xf32>
    "tpu.trace_stop"() : () -> ()
    %98 = vector.shape_cast %85 : vector<8xf32> to vector<1x1x8xf32>
    %99 = vector.broadcast %98 : vector<1x1x8xf32> to vector<8x8x8xf32>
    %100 = arith.addf %97, %99 : vector<8x8x8xf32>
    %101 = arith.addf %100, %60 : vector<8x8x8xf32>
    %cst_56 = arith.constant 0.000000e+00 : f32
    %102 = vector.broadcast %cst_56 : f32 to vector<8x8x8xf32>
    %103 = arith.maximumf %101, %102 : vector<8x8x8xf32>
    %c0_57 = arith.constant 0 : index
    %c0_58 = arith.constant 0 : index
    %c0_59 = arith.constant 0 : index
    %c0_60 = arith.constant 0 : index
    %104 = vector.load %arg8[%c0_57, %c0_58, %c0_59, %c0_60] : memref<1x8x8x8xf32, #tpu.memory_space<vmem>>, vector<1x8x8x8xf32>
    %105 = vector.shape_cast %104 : vector<1x8x8x8xf32> to vector<8x8x8xf32>
    %106 = vector.shape_cast %103 : vector<8x8x8xf32> to vector<1x8x8x8xf32>
    tpu.vector_store %arg8[%c0_57, %c0_58, %c0_59, %c0_60], %106 {strides = array<i32>} : memref<1x8x8x8xf32, #tpu.memory_space<vmem>>, vector<1x8x8x8xf32>,
    return
  }
  func.func @transform_0(%arg0: i32) -> (i32, i32, i32, i32) {
    %c0_i32 = arith.constant 0 : i32
    %c0_i32_0 = arith.constant 0 : i32
    %c0_i32_1 = arith.constant 0 : i32
    %c0_i32_2 = arith.constant 0 : i32
    return %arg0, %c0_i32, %c0_i32_0, %c0_i32_1 : i32, i32, i32, i32
  }
  func.func @transform_1(%arg0: i32) -> (i32, i32) {
    %c0_i32 = arith.constant 0 : i32
    %c0_i32_0 = arith.constant 0 : i32
    %c0_i32_1 = arith.constant 0 : i32
    return %c0_i32, %c0_i32_0 : i32, i32
  }
  func.func @transform_2(%arg0: i32) -> (i32, i32) {
    %c0_i32 = arith.constant 0 : i32
    %c0_i32_0 = arith.constant 0 : i32
    %c0_i32_1 = arith.constant 0 : i32
    return %c0_i32, %c0_i32_0 : i32, i32
  }
  func.func @transform_3(%arg0: i32) -> (i32, i32) {
    %c0_i32 = arith.constant 0 : i32
    %c0_i32_0 = arith.constant 0 : i32
    %c0_i32_1 = arith.constant 0 : i32
    return %c0_i32, %c0_i32_0 : i32, i32
  }
  func.func @transform_4(%arg0: i32) -> (i32, i32) {
    %c0_i32 = arith.constant 0 : i32
    %c0_i32_0 = arith.constant 0 : i32
    %c0_i32_1 = arith.constant 0 : i32
    return %c0_i32, %c0_i32_0 : i32, i32
  }
  func.func @transform_5(%arg0: i32) -> (i32, i32) {
    %c0_i32 = arith.constant 0 : i32
    %c0_i32_0 = arith.constant 0 : i32
    %c0_i32_1 = arith.constant 0 : i32
    return %c0_i32, %c0_i32_0 : i32, i32
  }
  func.func @transform_6(%arg0: i32) -> (i32, i32) {
    %c0_i32 = arith.constant 0 : i32
    %c0_i32_0 = arith.constant 0 : i32
    %c0_i32_1 = arith.constant 0 : i32
    return %c0_i32, %c0_i32_0 : i32, i32
  }
  func.func @transform_7(%arg0: i32) -> (i32, i32, i32, i32) {
    %c0_i32 = arith.constant 0 : i32
    %c0_i32_0 = arith.constant 0 : i32
    %c0_i32_1 = arith.constant 0 : i32
    %c0_i32_2 = arith.constant 0 : i32
    return %arg0, %c0_i32, %c0_i32_0, %c0_i32_1 : i32, i32, i32, i32
  }
}

</mosaic_0001>

<bundles_post_ra>
// kernel: tpu_custom_call.1
= control target key start
LH: loop header
LB: loop body
LE: loop exit
PB: predicated region body
PF: predicated region fallthrough
CT: control target
= control target key end

     0   :  { %12 = vsyncpa [#allocation6], 0  ;;  %s4618_s0 = inlined_call_operand.vmem [shape: f32[2,36,9,4], index: 0, kind: input, shape index: {}]   ;;  %s4619_s1 = inlined_call_operand.vmem [shape: f32[36,8], index: 1, kind: input, shape index: {}]   ;;  %s4620_s2 = inlined_call_operand.vmem [shape: f32[4,8], index: 2, kind: input, shape index: {}]   ;;  %s4621_s3 = inlined_call_operand.vmem [shape: f32[72,8], index: 3, kind: input, shape index: {}]   ;;  %s4622_s4 = inlined_call_operand.vmem [shape: f32[72,8], index: 4, kind: input, shape index: {}]   ;;  %s4623_s5 = inlined_call_operand.vmem [shape: f32[72,8], index: 5, kind: input, shape index: {}]   ;;  %s4624_s6 = inlined_call_operand.vmem [shape: f32[5,8], index: 6, kind: input, shape index: {}]   ;;  %s4625_s7 = inlined_call_operand.hbm [shape: f32[2,8,8,8], index: 7, kind: output, shape index: {}]  }
   0x1   :  { %14 = vsyncpa [#allocation6 + $0x1], 0  ;;  %s3139_s24 = smov 0   ;;  %s3141_s25 = smov 0  }
   0x2   :  { %s3143_s26 = smov 0   ;;  %s3145_s27 = smov 0  }
   0x3 LB: > { %s3160_s28 = sadd.s32 4294967295, %s3082_s27   ;;  %s2692_s29 = sadd.s32 4294967294, %s3082_s27   ;;  %s3082_s27 = sphi %s3145_s27, %s4631_s27   ;;  %s3078_s26 = sphi %s3143_s26, %s4630_s26   ;;  %s3074_s25 = sphi %s3141_s25, %s4629_s25   ;;  %s3070_s24 = sphi %s3139_s24, %s4628_s24  }
   0x4   : > { %s3164_s30 = sadd.s32 1, %s3082_s27   ;;  %s179_s8 = sadd.s32 1, %s3078_s26 }
   0x5   : > { %s176_s9 = ssub.s32 %s3082_s27, %s3164_s30  ;;  %p189_p0 = scmp.ne.s32.totalorder %s3078_s26, %s3074_s25 }
   0x6   : > { %p177_p1 = scmp.eq.s32.totalorder %s176_s9, 0  ;;  %p190_p2 = scmp.eq.s32.totalorder %s3160_s28, 1 }
   0x7   : > { %p195_p3 = scmp.ne.s32.totalorder %s3074_s25, %s3070_s24  ;;  %p196_p4 = scmp.eq.s32.totalorder %s2692_s29, 1 }
   0x8   : > { %s3175_s10 = scalar_select %p177_p1, %s3078_s26, %s179_s8  }
   0x9   : > { %p3177_p5 = por %p190_p2, %p189_p0  ;;  %p3181_p6 = por %p196_p4, %p195_p3 }
   0xa   : > { %p2695_p7 = scmp.ge.s32.totalorder %s3082_s27, 1  ;;  %p240_p8 = scmp.lt.s32.totalorder %s3082_s27, 3 }
   0xc   : > { %p241_p9 = pnand %p2695_p7, %p240_p8 }
   0xd   : > { %p272_p10 = scmp.lt.s32.totalorder (!%p241_p9), %s3160_s28, 1  ;;  %s3084_s18 = smov (!%p241_p9), 12  }
   0xe   : > { %244 = sbr.rel (%p241_p9) target bundleno = 1674 (0x68a), region = 48  ;;  %s3085_s19 = smov (!%p241_p9), 4  }
   0xf   : > { %s3086_s20 = smov (!%p241_p9), 8   ;;  %s3087_s21 = smov (!%p241_p9), 16  }
  0x10   : > { %s3088_s22 = smov (!%p241_p9), 20   ;;  %s3089_s8 = smov (!%p241_p9), 24  }
  0x11   : > { %s3090_s29 = smov (!%p241_p9), 28   ;;  %s3095_s15 = smov (!%p241_p9), 40  }
  0x12   : > { %s3097_s16 = smov (!%p241_p9), [#allocation5]  }
  0x13   : > { %s273_s13 = scalar_select %p272_p10, %s3160_s28, 1  ;;  %vm439_vm0 = vcmask 1046528   ;;  %vm686_vm1 = vcmask 31744   ;;  %v761_v35 = vld [vmem:[%s4619_s1 + $0x20] sm:$0xf]  ;;  %vm791_vm2 = vcmask 1043456  }
  0x14   : > { %2824 = vmatprep.subr.msk.mxu0 %vm791_vm2, %v761_v35  ;;  %v760_v38 = vld [vmem:[%s4619_s1 + $0x18] sm:$0xff]  ;;  %v759_v39 = vld [vmem:[%s4619_s1 + $0x10] sm:$0xff]  ;;  %v758_v40 = vld [vmem:[%s4619_s1 + $0x8] sm:$0xff]  ;;  %vm277_vm3 = vcmask 64512   ;;  %vm279_vm4 = vcmask 58368   ;;  %vm703_vm5 = vcmask 97280  }
  0x15   : > { %s2968_s14 = smul.u32 576, %s273_s13  ;;  %2825 = vmatpush3.msk.msra.mxu0 %vm791_vm2, %v761_v35  ;;  %v757_v43 = vld [vmem:[%s4619_s1] sm:$0xff]  ;;  %vm712_vm6 = vcmask 130048   ;;  %vm721_vm7 = vcmask 162816   ;;  %vm730_vm8 = vcmask 195584   ;;  %vm739_vm9 = vcmask 228352  }
  0x16   : > { %2826 = vmatprep.subr.mxu0 %v760_v38  ;;  %vm748_vm10 = vcmask 261120   ;;  %vm766_vm11 = vcmask 293888   ;;  %vm1132_vm12 = vcmask 1045504   ;;  %vm1373_vm13 = vcmask 326656   ;;  %s3026_s23 = sshll.u32 %s3097_s16, 4  ;;  %s3027_s23 = int_to_ptr.vmem [resolvable:$false] %s3026_s23 }
  0x17   : > { %s3192_s17 = scalar_lea.vmem %s4618_s0, %s2968_s14  ;;  %2827 = vmatpush3.msra.mxu0 %v760_v38  ;;  %s3091_s14 = smov 32   ;;  %vm1382_vm14 = vcmask 392192   ;;  %vm1391_vm15 = vcmask 457728  }
  0x18   : > { %v368_v0 = vld [vmem:[%s3192_s17 + $0x130] sm:$0xff]  ;;  %v3199_v2 = vld [vmem:[%s3192_s17] sm:$0xff]  ;;  %v340_v3 = vld [vmem:[%s3192_s17 + $0x8] sm:$0x1]  ;;  %2828 = vmatprep.subr.mxu0 %v759_v39 }
  0x19   : > { %v357_v1 = vld [vmem:[%s3192_s17 + $0x90] sm:$0xff]  ;;  %498 = vrot.lane.b32.xlu1 %v368_v0, %s3084_s18  ;;  %v3203_v4 = vld [vmem:[%s3192_s17 + $0xa0] sm:$0xff]  ;;  %v440_v5 = vrot.slane %v3199_v2, 1  ;;  %v441_v6 = vrot.slane %v340_v3, 1  ;;  %v342_v8 = vld [vmem:[%s3192_s17 + $0x18] sm:$0x1]  ;;  %2829 = vmatpush3.msra.mxu0 %v759_v39 }
  0x1a   : > { %399 = vrot.lane.b32.xlu0 %v357_v1, %s3085_s19  ;;  %v3207_v7 = vld [vmem:[%s3192_s17 + $0x10] sm:$0xff]  ;;  %v444_v10 = vrot.slane %v342_v8, 1  ;;  %v366_v13 = vld [vmem:[%s3192_s17 + $0x120] sm:$0xff]  ;;  %v367_v15 = vld [vmem:[%s3192_s17 + $0x128] sm:$0x1]  ;;  %v563_v26 = vrot.slane %v368_v0, 1  ;;  %2830 = vmatprep.subr.mxu0 %v758_v40 }
  0x1b   : > { %v443_v9 = vrot.slane %v3207_v7, 1  ;;  %v382_v11 = vld [vmem:[%s3192_s17 + $0x1b0] sm:$0xff]  ;;  %v442_v12 = vsel %vm439_vm0, %v440_v5, %v441_v6  ;;  %v560_v16 = vrot.slane %v366_v13, 1  ;;  %v561_v18 = vrot.slane %v367_v15, 1  ;;  %v3227_v19 = vld [vmem:[%s3192_s17 + $0x20] sm:$0xff]  ;;  %2831 = vmatpush3.msra.mxu0 %v758_v40 }
  0x1c   : > { %2848 = vmatprep.mubr.msk.f32.mxu1 %vm686_vm1, %v382_v11  ;;  %v359_v17 = vld [vmem:[%s3192_s17 + $0xb0] sm:$0xff]  ;;  %v344_v20 = vld [vmem:[%s3192_s17 + $0x28] sm:$0x1]  ;;  %v3233_v21 = vld [vmem:[%s3192_s17 + $0x1c0] sm:$0xff]  ;;  %v446_v23 = vrot.slane %v3227_v19, 1  ;;  %2832 = vmatprep.subr.mxu0 %v757_v43 }
  0x1d   : > { %464 = vrot.lane.b32.xlu1 %v442_v12, %s3086_s20  ;;  %v3219_v14 = vsel %vm439_vm0, %v443_v9, %v444_v10  ;;  %v562_v22 = vsel %vm439_vm0, %v560_v16, %v561_v18  ;;  %v447_v24 = vrot.slane %v344_v20, 1  ;;  %v369_v25 = vld [vmem:[%s3192_s17 + $0x138] sm:$0x1]  ;;  %v3242_v27 = vld [vmem:[%s3192_s17 + $0xc0] sm:$0xff]  ;;  %v3246_v30 = vld [vmem:[%s3192_s17 + $0x30] sm:$0xff]  ;;  %2833 = vmatpush3.msra.mxu0 %v757_v43 }
  0x1e   : > { %401 = vrot.lane.b32.xlu0 %v3203_v4, %s3085_s19  ;;  %v564_v29 = vrot.slane %v369_v25, 1  ;;  %v346_v31 = vld [vmem:[%s3192_s17 + $0x38] sm:$0x1]  ;;  %v449_v33 = vrot.slane %v3246_v30, 1  ;;  %v370_v37 = vld [vmem:[%s3192_s17 + $0x140] sm:$0xff]  ;;  %v372_v41 = vld [vmem:[%s3192_s17 + $0x150] sm:$0xff] }
  0x1f   : > { %v448_v28 = vsel %vm439_vm0, %v446_v23, %v447_v24  ;;  %v450_v34 = vrot.slane %v346_v31, 1  ;;  %v3284_v42 = vld [vmem:[%s3192_s17 + $0x1d0] sm:$0xff]  ;;  %v371_v44 = vld [vmem:[%s3192_s17 + $0x148] sm:$0x1]  ;;  %v566_v45 = vrot.slane %v370_v37, 1  ;;  %v3298_v47 = vld [vmem:[%s3192_s17 + $0x1e0] sm:$0xff] }
  0x20   : > { %v565_v32 = vsel %vm439_vm0, %v563_v26, %v564_v29  ;;  %v361_v46 = vld [vmem:[%s3192_s17 + $0xd0] sm:$0xff]  ;;  %v567_v48 = vrot.slane %v371_v44, 1  ;;  %v3301_v49 = vld [vmem:[%s3192_s17 + $0x40] sm:$0xff]  ;;  %v348_v50 = vld [vmem:[%s3192_s17 + $0x48] sm:$0x1]  ;;  %v569_v55 = vrot.slane %v372_v41, 1 }
  0x21   : > { %466 = vrot.lane.b32.xlu1 %v3219_v14, %s3086_s20  ;;  %v3261_v36 = vsel %vm439_vm0, %v449_v33, %v450_v34  ;;  %v452_v52 = vrot.slane %v3301_v49, 1  ;;  %v453_v53 = vrot.slane %v348_v50, 1  ;;  %v373_v54 = vld [vmem:[%s3192_s17 + $0x158] sm:$0x1]  ;;  %v362_v56 = vld [vmem:[%s3192_s17 + $0xe0] sm:$0xff]  ;;  %v3315_v59 = vld [vmem:[%s3192_s17 + $0x50] sm:$0xff] }
  0x22   : > { %496 = vrot.lane.b32.xlu0 %v366_v13, %s3084_s18  ;;  %v568_v51 = vsel %vm439_vm0, %v566_v45, %v567_v48  ;;  %v570_v58 = vrot.slane %v373_v54, 1  ;;  %v350_v60 = vld [vmem:[%s3192_s17 + $0x58] sm:$0x1]  ;;  %v455_v62 = vrot.slane %v3315_v59, 1  ;;  %v374_v1 = vld [vmem:[%s3192_s17 + $0x160] sm:$0xff]  ;;  %v376_v3 = vld [vmem:[%s3192_s17 + $0x170] sm:$0xff] }
  0x23   : > { %v454_v57 = vsel %vm439_vm0, %v452_v52, %v453_v53  ;;  %v456_v63 = vrot.slane %v350_v60, 1  ;;  %v375_v5 = vld [vmem:[%s3192_s17 + $0x168] sm:$0x1]  ;;  %v572_v6 = vrot.slane %v374_v1, 1  ;;  %v363_v8 = vld [vmem:[%s3192_s17 + $0xf0] sm:$0xff]  ;;  %v3346_v9 = vld [vmem:[%s3192_s17 + $0x200] sm:$0xff] }
  0x24   : > { %v571_v61 = vsel %vm439_vm0, %v569_v55, %v570_v58  ;;  %v573_v10 = vrot.slane %v375_v5, 1  ;;  %v352_v12 = vld [vmem:[%s3192_s17 + $0x68] sm:$0x1]  ;;  %v377_v16 = vld [vmem:[%s3192_s17 + $0x178] sm:$0x1]  ;;  %v3361_v18 = vld [vmem:[%s3192_s17 + $0x100] sm:$0xff] }
  0x25   : > { %403 = vrot.lane.b32.xlu1 %v359_v17, %s3085_s19  ;;  %v457_v0 = vsel %vm439_vm0, %v455_v62, %v456_v63  ;;  %v459_v15 = vrot.slane %v352_v12, 1  ;;  %v3365_v23 = vld [vmem:[%s3192_s17 + $0x70] sm:$0xff]  ;;  %v354_v24 = vld [vmem:[%s3192_s17 + $0x78] sm:$0x1]  ;;  %v378_v29 = vld [vmem:[%s3192_s17 + $0x180] sm:$0xff]  ;;  %v3092_v48 = vmov 0.0  }
  0x26   : > { %528 = vrot.lane.b32.xlu0 %v382_v11, %s3087_s21  ;;  %v3349_v11 = vld [vmem:[%s3192_s17 + $0x60] sm:$0xff]  ;;  %v574_v13 = vsel %vm439_vm0, %v572_v6, %v573_v10  ;;  %v461_v26 = vrot.slane %v3365_v23, 1  ;;  %v380_v31 = vld [vmem:[%s3192_s17 + $0x190] sm:$0xff]  ;;  %v379_v33 = vld [vmem:[%s3192_s17 + $0x188] sm:$0x1]  ;;  %v578_v34 = vrot.slane %v378_v29, 1 }
  0x27   : > { %v579_v35 = vrot.slane %v379_v33, 1  ;;  %v3398_v38 = vld [vmem:[%s3192_s17 + $0x220] sm:$0xff]  ;;  %283 = vst.msk [vmem:[#allocation2 + $0x20] sm:$0xff] %vm277_vm3, %v3092_v48  ;;  %278 = vst.msk [vmem:[#allocation2] sm:$0xff] %vm277_vm3, %v3092_v48 }
  0x28   : > { %v3408_v43 = vld [vmem:[%s3192_s17 + $0x80] sm:$0xff]  ;;  %284 = vst.msk [vmem:[#allocation2 + $0x28] sm:$0x3] %vm279_vm4, %v3092_v48  ;;  %280 = vst.msk [vmem:[#allocation2 + $0x8] sm:$0x3] %vm279_vm4, %v3092_v48 }
  0x29   : > { %584 = vrot.lane.b32.xlu1 %v562_v22, %s3088_s22  ;;  %v576_v22 = vrot.slane %v377_v16, 1  ;;  %v580_v39 = vsel %vm439_vm0, %v578_v34, %v579_v35  ;;  %281 = vst.msk [vmem:[#allocation2 + $0x10] sm:$0xff] %vm277_vm3, %v3092_v48  ;;  %285 = vst.msk [vmem:[#allocation2 + $0x30] sm:$0xff] %vm277_vm3, %v3092_v48  ;;  %v659_v50 = vrot.slane %v3408_v43, 1 }
  0x2a   : > { %530 = vrot.lane.b32.xlu0 %v3233_v21, %s3087_s21  ;;  %282 = vst.msk [vmem:[#allocation2 + $0x18] sm:$0x3] %vm279_vm4, %v3092_v48  ;;  %286 = vst.msk [vmem:[#allocation2 + $0x38] sm:$0x3] %vm279_vm4, %v3092_v48 }
  0x2b   : > { %287 = vst.msk [vmem:[#allocation2 + $0x40] sm:$0xff] %vm277_vm3, %v3092_v48  ;;  %289 = vst.msk [vmem:[#allocation2 + $0x50] sm:$0xff] %vm277_vm3, %v3092_v48 }
  0x2c   : > { %288 = vst.msk [vmem:[#allocation2 + $0x48] sm:$0x3] %vm279_vm4, %v3092_v48  ;;  %290 = vst.msk [vmem:[#allocation2 + $0x58] sm:$0x3] %vm279_vm4, %v3092_v48 }
  0x2d   : > { %468 = vrot.lane.b32.xlu1 %v448_v28, %s3086_s20  ;;  %291 = vst.msk [vmem:[#allocation2 + $0x60] sm:$0xff] %vm277_vm3, %v3092_v48  ;;  %293 = vst.msk [vmem:[#allocation2 + $0x70] sm:$0xff] %vm277_vm3, %v3092_v48 }
  0x2e   : > { %405 = vrot.lane.b32.xlu0 %v3242_v27, %s3085_s19  ;;  %292 = vst.msk [vmem:[#allocation2 + $0x68] sm:$0x3] %vm279_vm4, %v3092_v48  ;;  %294 = vst.msk [vmem:[#allocation2 + $0x78] sm:$0x3] %vm279_vm4, %v3092_v48 }
  0x2f   : > { %295 = vst.msk [vmem:[#allocation2 + $0x80] sm:$0xff] %vm277_vm3, %v3092_v48  ;;  %297 = vst.msk [vmem:[#allocation2 + $0x90] sm:$0xff] %vm277_vm3, %v3092_v48 }
  0x30   : > { %296 = vst.msk [vmem:[#allocation2 + $0x88] sm:$0x3] %vm279_vm4, %v3092_v48  ;;  %298 = vst.msk [vmem:[#allocation2 + $0x98] sm:$0x3] %vm279_vm4, %v3092_v48 }
  0x31   : > { %609 = vrot.lane.b32.xlu1 %v3207_v7, %s3089_s8  ;;  %299 = vst.msk [vmem:[#allocation3] sm:$0xff] %vm277_vm3, %v3092_v48  ;;  %301 = vst.msk [vmem:[#allocation3 + $0x10] sm:$0xff] %vm277_vm3, %v3092_v48 }
  0x32   : > { %586 = vrot.lane.b32.xlu0 %v565_v32, %s3088_s22  ;;  %v3388_v32 = vld [vmem:[%s3192_s17 + $0x210] sm:$0xff]  ;;  %300 = vst.msk [vmem:[#allocation3 + $0x8] sm:$0x3] %vm279_vm4, %v3092_v48  ;;  %302 = vst.msk [vmem:[#allocation3 + $0x18] sm:$0x3] %vm279_vm4, %v3092_v48 }
  0x33   : > { %303 = vst.msk [vmem:[#allocation3 + $0x20] sm:$0xff] %vm277_vm3, %v3092_v48  ;;  %305 = vst.msk [vmem:[#allocation3 + $0x30] sm:$0xff] %vm277_vm3, %v3092_v48 }
  0x34   : > { %304 = vst.msk [vmem:[#allocation3 + $0x28] sm:$0x3] %vm279_vm4, %v3092_v48  ;;  %306 = vst.msk [vmem:[#allocation3 + $0x38] sm:$0x3] %vm279_vm4, %v3092_v48 }
  0x35   : > { %500 = vrot.lane.b32.xlu1 %v370_v37, %s3084_s18  ;;  %v581_v37 = vrot.slane %v380_v31, 1  ;;  %307 = vst.msk [vmem:[#allocation3 + $0x40] sm:$0xff] %vm277_vm3, %v3092_v48  ;;  %309 = vst.msk [vmem:[#allocation3 + $0x50] sm:$0xff] %vm277_vm3, %v3092_v48 }
  0x36   : > { %470 = vrot.lane.b32.xlu0 %v3261_v36, %s3086_s20  ;;  %308 = vst.msk [vmem:[#allocation3 + $0x48] sm:$0x3] %vm279_vm4, %v3092_v48  ;;  %310 = vst.msk [vmem:[#allocation3 + $0x58] sm:$0x3] %vm279_vm4, %v3092_v48 }
  0x37   : > { %311 = vst.msk [vmem:[#allocation3 + $0x60] sm:$0xff] %vm277_vm3, %v3092_v48  ;;  %313 = vst.msk [vmem:[#allocation3 + $0x70] sm:$0xff] %vm277_vm3, %v3092_v48 }
  0x38   : > { %312 = vst.msk [vmem:[#allocation3 + $0x68] sm:$0x3] %vm279_vm4, %v3092_v48  ;;  %314 = vst.msk [vmem:[#allocation3 + $0x78] sm:$0x3] %vm279_vm4, %v3092_v48 }
  0x39   : > { %634 = vrot.lane.b32.xlu1 %v3203_v4, %s3090_s29  ;;  %v3335_v4 = vld [vmem:[%s3192_s17 + $0x1f0] sm:$0xff]  ;;  %315 = vst.msk [vmem:[#allocation3 + $0x80] sm:$0xff] %vm277_vm3, %v3092_v48  ;;  %317 = vst.msk [vmem:[#allocation3 + $0x90] sm:$0xff] %vm277_vm3, %v3092_v48 }
  0x3a   : > { %611 = vrot.lane.b32.xlu0 %v3227_v19, %s3089_s8  ;;  %316 = vst.msk [vmem:[#allocation3 + $0x88] sm:$0x3] %vm279_vm4, %v3092_v48  ;;  %318 = vst.msk [vmem:[#allocation3 + $0x98] sm:$0x3] %vm279_vm4, %v3092_v48 }
  0x3b   : > { %319 = vst.msk [vmem:[#allocation4] sm:$0xff] %vm277_vm3, %v3092_v48  ;;  %321 = vst.msk [vmem:[#allocation4 + $0x10] sm:$0xff] %vm277_vm3, %v3092_v48 }
  0x3c   : > { %320 = vst.msk [vmem:[#allocation4 + $0x8] sm:$0x3] %vm279_vm4, %v3092_v48  ;;  %322 = vst.msk [vmem:[#allocation4 + $0x18] sm:$0x3] %vm279_vm4, %v3092_v48 }
  0x3d   : > { %532 = vrot.lane.b32.xlu1 %v3284_v42, %s3087_s21  ;;  %323 = vst.msk [vmem:[#allocation4 + $0x20] sm:$0xff] %vm277_vm3, %v3092_v48  ;;  %325 = vst.msk [vmem:[#allocation4 + $0x30] sm:$0xff] %vm277_vm3, %v3092_v48 }
  0x3e   : > { %502 = vrot.lane.b32.xlu0 %v372_v41, %s3084_s18  ;;  %324 = vst.msk [vmem:[#allocation4 + $0x28] sm:$0x3] %vm279_vm4, %v3092_v48  ;;  %326 = vst.msk [vmem:[#allocation4 + $0x38] sm:$0x3] %vm279_vm4, %v3092_v48 }
  0x3f   : > { %327 = vst.msk [vmem:[#allocation4 + $0x40] sm:$0xff] %vm277_vm3, %v3092_v48  ;;  %329 = vst.msk [vmem:[#allocation4 + $0x50] sm:$0xff] %vm277_vm3, %v3092_v48 }
  0x40   : > { %328 = vst.msk [vmem:[#allocation4 + $0x48] sm:$0x3] %vm279_vm4, %v3092_v48  ;;  %330 = vst.msk [vmem:[#allocation4 + $0x58] sm:$0x3] %vm279_vm4, %v3092_v48 }
  0x41   : > { %662 = vrot.lane.b32.xlu1 %v3219_v14, %s3091_s14  ;;  %v458_v14 = vrot.slane %v3349_v11, 1  ;;  %331 = vst.msk [vmem:[#allocation4 + $0x60] sm:$0xff] %vm277_vm3, %v3092_v48  ;;  %333 = vst.msk [vmem:[#allocation4 + $0x70] sm:$0xff] %vm277_vm3, %v3092_v48 }
  0x42   : > { %636 = vrot.lane.b32.xlu0 %v359_v17, %s3090_s29  ;;  %v575_v17 = vrot.slane %v376_v3, 1  ;;  %332 = vst.msk [vmem:[#allocation4 + $0x68] sm:$0x3] %vm279_vm4, %v3092_v48  ;;  %334 = vst.msk [vmem:[#allocation4 + $0x78] sm:$0x3] %vm279_vm4, %v3092_v48 }
  0x43   : > { %v460_v20 = vsel %vm439_vm0, %v458_v14, %v459_v15  ;;  %335 = vst.msk [vmem:[#allocation4 + $0x80] sm:$0xff] %vm277_vm3, %v3092_v48  ;;  %337 = vst.msk [vmem:[#allocation4 + $0x90] sm:$0xff] %vm277_vm3, %v3092_v48 }
  0x44   : > { %v577_v25 = vsel %vm439_vm0, %v575_v17, %v576_v22  ;;  %336 = vst.msk [vmem:[#allocation4 + $0x88] sm:$0x3] %vm279_vm4, %v3092_v48  ;;  %338 = vst.msk [vmem:[#allocation4 + $0x98] sm:$0x3] %vm279_vm4, %v3092_v48 }
  0x45   : > { %534 = vrot.lane.b32.xlu1 %v3298_v47, %s3087_s21 }
  0x46   : > { %407 = vrot.lane.b32.xlu0 %v361_v46, %s3085_s19 }
  0x49   : > { %664 = vrot.lane.b32.xlu1 %v448_v28, %s3091_s14 }
  0x4a   : > { %588 = vrot.lane.b32.xlu0 %v568_v51, %s3088_s22  ;;  %v365_v51 = vld [vmem:[%s3192_s17 + $0x110] sm:$0xff] }
  0x4d   : > { %472 = vrot.lane.b32.xlu1 %v454_v57, %s3086_s20 }
  0x4e   : > { %409 = vrot.lane.b32.xlu0 %v362_v56, %s3085_s19 }
  0x51   : > { %613 = vrot.lane.b32.xlu1 %v3246_v30, %s3089_s8 }
  0x52   : > { %590 = vrot.lane.b32.xlu0 %v571_v61, %s3088_s22 }
  0x55   : > { %504 = vrot.lane.b32.xlu1 %v374_v1, %s3084_s18 }
  0x56   : > { %474 = vrot.lane.b32.xlu0 %v457_v0, %s3086_s20 }
  0x59   : > { %638 = vrot.lane.b32.xlu1 %v3242_v27, %s3090_s29  ;;  %v462_v27 = vrot.slane %v354_v24, 1 }
  0x5a   : > { %615 = vrot.lane.b32.xlu0 %v3301_v49, %s3089_s8 }
  0x5b   : > { %v3377_v28 = vsel %vm439_vm0, %v461_v26, %v462_v27 }
  0x5d   : > { %536 = vrot.lane.b32.xlu1 %v3335_v4, %s3087_s21 }
  0x5e   : > { %506 = vrot.lane.b32.xlu0 %v376_v3, %s3084_s18 }
  0x61   : > { %666 = vrot.lane.b32.xlu1 %v3261_v36, %s3091_s14  ;;  %v381_v36 = vld [vmem:[%s3192_s17 + $0x198] sm:$0x1] }
  0x62   : > { %640 = vrot.lane.b32.xlu0 %v361_v46, %s3090_s29  ;;  %v582_v40 = vrot.slane %v381_v36, 1  ;;  %v3415_v46 = vld [vmem:[%s3192_s17 + $0x88] sm:$0x1]  ;;  %s3093_s17 = smov 48  }
  0x63   : > { %v660_v52 = vrot.slane %v3415_v46, 1 }
  0x64   : > { %v583_v41 = vsel %vm439_vm0, %v581_v37, %v582_v40 }
  0x65   : > { %538 = vrot.lane.b32.xlu1 %v3346_v9, %s3087_s21  ;;  %v661_v55 = vsel %vm439_vm0, %v659_v50, %v660_v52 }
  0x66   : > { %411 = vrot.lane.b32.xlu0 %v363_v8, %s3085_s19 }
  0x69   : > { %668 = vrot.lane.b32.xlu1 %v454_v57, %s3091_s14 }
  0x6a   : > { %592 = vrot.lane.b32.xlu0 %v574_v13, %s3088_s22 }
  0x6d   : > { %476 = vrot.lane.b32.xlu1 %v460_v20, %s3086_s20 }
  0x6e   : > { %413 = vrot.lane.b32.xlu0 %v3361_v18, %s3085_s19 }
  0x71   : > { %617 = vrot.lane.b32.xlu1 %v3315_v59, %s3089_s8 }
  0x72   : > { %594 = vrot.lane.b32.xlu0 %v577_v25, %s3088_s22 }
  0x75   : > { %508 = vrot.lane.b32.xlu1 %v378_v29, %s3084_s18 }
  0x76   : > { %478 = vrot.lane.b32.xlu0 %v3377_v28, %s3086_s20 }
  0x79   : > { %642 = vrot.lane.b32.xlu1 %v362_v56, %s3090_s29 }
  0x7a   : > { %619 = vrot.lane.b32.xlu0 %v3349_v11, %s3089_s8 }
  0x7d   : > { %540 = vrot.lane.b32.xlu1 %v3388_v32, %s3087_s21 }
  0x7e   : > { %510 = vrot.lane.b32.xlu0 %v380_v31, %s3084_s18  ;;  %s3094_s18 = smov 56  }
  0x81   : > { %670 = vrot.lane.b32.xlu1 %v457_v0, %s3091_s14 }
  0x82   : > { %644 = vrot.lane.b32.xlu0 %v363_v8, %s3090_s29 }
  0x85   : > { %596 = vrot.lane.b32.xlu1 %v580_v39, %s3088_s22 }
  0x86   : > { %542 = vrot.lane.b32.xlu0 %v3398_v38, %s3087_s21 }
  0x89   : > { %598 = vrot.lane.b32.xlu1 %v583_v41, %s3088_s22 }
  0x8a   : > { %672 = vrot.lane.b32.xlu0 %v460_v20, %s3091_s14 }
  0x8b   : > { %v3410_v44 = vpop.permute.xlu1 %498 }
  0x8c   : > { %v3412_v45 = vpop.permute.xlu0 %399 }
  0x8d   : > { %623 = vrot.lane.b32.xlu1 %v3408_v43, %s3089_s8  ;;  %v687_v12 = vsel %vm686_vm1, %v3199_v2, %v3412_v45 }
  0x8e   : > { %621 = vrot.lane.b32.xlu0 %v3365_v23, %s3089_s8 }
  0x8f   : > { %v465_v54 = vpop.permute.xlu1 %464 }
  0x90   : > { %v402_v53 = vpop.permute.xlu0 %401  ;;  %v695_v13 = vsel %vm277_vm3, %v687_v12, %v465_v54 }
  0x91   : > { %648 = vrot.lane.b32.xlu1 %v365_v51, %s3090_s29  ;;  %v688_v2 = vsel %vm686_vm1, %v3207_v7, %v402_v53 }
  0x92   : > { %646 = vrot.lane.b32.xlu0 %v3361_v18, %s3090_s29  ;;  %s3096_s29 = smov 64  }
  0x93   : > { %v467_v57 = vpop.permute.xlu1 %466 }
  0x94   : > { %v497_v56 = vpop.permute.xlu0 %496  ;;  %v696_v26 = vsel %vm277_vm3, %v688_v2, %v467_v57 }
  0x95   : > { %676 = vrot.lane.b32.xlu1 %v661_v55, %s3091_s14  ;;  %v704_v14 = vsel %vm703_vm5, %v695_v13, %v497_v56 }
  0x96   : > { %674 = vrot.lane.b32.xlu0 %v3377_v28, %s3091_s14  ;;  %v705_v28 = vsel %vm703_vm5, %v696_v26, %v3410_v44 }
  0x97   : > { %v404_v60 = vpop.permute.xlu1 %403 }
  0x98   : > { %v529_v58 = vpop.permute.xlu0 %528  ;;  %v689_v48 = vsel %vm686_vm1, %v3227_v19, %v404_v60 }
  0x99   : > { %v713_v17 = vsel %vm712_vm6, %v704_v14, %v529_v58 }
  0x9b   : > { %v585_v62 = vpop.permute.xlu1 %584 }
  0x9c   : > { %v531_v61 = vpop.permute.xlu0 %530  ;;  %v722_v18 = vsel %vm721_vm7, %v713_v17, %v585_v62 }
  0x9d   : > { %v714_v33 = vsel %vm712_vm6, %v705_v28, %v531_v61 }
  0x9f   : > { %v469_v0 = vpop.permute.xlu1 %468 }
  0xa0   : > { %v406_v63 = vpop.permute.xlu0 %405  ;;  %v697_v52 = vsel %vm277_vm3, %v689_v48, %v469_v0 }
  0xa1   : > { %v690_v60 = vsel %vm686_vm1, %v3246_v30, %v406_v63 }
  0xa3   : > { %v610_v3 = vpop.permute.xlu1 %609 }
  0xa4   : > { %v587_v1 = vpop.permute.xlu0 %586  ;;  %v731_v20 = vsel %vm730_vm8, %v722_v18, %v610_v3 }
  0xa5   : > { %v723_v34 = vsel %vm721_vm7, %v714_v33, %v587_v1 }
  0xa7   : > { %v501_v6 = vpop.permute.xlu1 %500 }
  0xa8   : > { %v471_v5 = vpop.permute.xlu0 %470  ;;  %v706_v53 = vsel %vm703_vm5, %v697_v52, %v501_v6 }
  0xa9   : > { %v698_v0 = vsel %vm277_vm3, %v690_v60, %v471_v5 }
  0xab   : > { %v635_v10 = vpop.permute.xlu1 %634 }
  0xac   : > { %v612_v8 = vpop.permute.xlu0 %611  ;;  %v740_v22 = vsel %vm739_vm9, %v731_v20, %v635_v10 }
  0xad   : > { %v732_v7 = vsel %vm730_vm8, %v723_v34, %v612_v8 }
  0xaf   : > { %v533_v16 = vpop.permute.xlu1 %532 }
  0xb0   : > { %v503_v15 = vpop.permute.xlu0 %502  ;;  %v715_v56 = vsel %vm712_vm6, %v706_v53, %v533_v16 }
  0xb1   : > { %v707_v3 = vsel %vm703_vm5, %v698_v0, %v503_v15 }
  0xb3   : > { %v663_v25 = vpop.permute.xlu1 %662 }
  0xb4   : > { %v637_v24 = vpop.permute.xlu0 %636  ;;  %v749_v27 = vsel %vm748_vm10, %v740_v22, %v663_v25 }
  0xb5   : > { %2834 = vmatprep.mubr.msk.f32.mxu0 %vm766_vm11, %v749_v27  ;;  %v741_v35 = vsel %vm739_vm9, %v732_v7, %v637_v24 }
  0xb7   : > { %v535_v31 = vpop.permute.xlu1 %534 }
  0xb8   : > { %v408_v29 = vpop.permute.xlu0 %407  ;;  %v716_v10 = vsel %vm712_vm6, %v707_v3, %v535_v31 }
  0xb9   : > { %v691_v25 = vsel %vm686_vm1, %v3301_v49, %v408_v29 }
  0xbb   : > { %v665_v37 = vpop.permute.xlu1 %664 }
  0xbc   : > { %v589_v36 = vpop.permute.xlu0 %588  ;;  %v750_v39 = vsel %vm748_vm10, %v741_v35, %v665_v37 }
  0xbd   : > { %2835 = vmatmul.mubr.msk.f32.vlgmr.msra.gmra.mxu0 %vm766_vm11, %v750_v39  ;;  %v724_v57 = vsel %vm721_vm7, %v715_v56, %v589_v36  ;;  %v3557_v56 = vld [vmem:[#allocation2] sm:$0xff] }
  0xbf   : > { %v473_v41 = vpop.permute.xlu1 %472 }
  0xc0   : > { %v410_v40 = vpop.permute.xlu0 %409  ;;  %v699_v26 = vsel %vm277_vm3, %v691_v25, %v473_v41 }
  0xc1   : > { %v692_v49 = vsel %vm686_vm1, %v3315_v59, %v410_v40 }
  0xc3   : > { %v614_v44 = vpop.permute.xlu1 %613 }
  0xc4   : > { %v591_v43 = vpop.permute.xlu0 %590  ;;  %v733_v58 = vsel %vm730_vm8, %v724_v57, %v614_v44  ;;  %v1048_v57 = vld [vmem:[#allocation2 + $0x8] sm:$0x3] }
  0xc5   : > { %v725_v12 = vsel %vm721_vm7, %v716_v10, %v591_v43 }
  0xc7   : > { %v505_v46 = vpop.permute.xlu1 %504 }
  0xc8   : > { %v475_v45 = vpop.permute.xlu0 %474  ;;  %v708_v27 = vsel %vm703_vm5, %v699_v26, %v505_v46 }
  0xc9   : > { %v700_v29 = vsel %vm277_vm3, %v692_v49, %v475_v45 }
  0xcb   : > { %v639_v51 = vpop.permute.xlu1 %638 }
  0xcc   : > { %v616_v50 = vpop.permute.xlu0 %615  ;;  %v742_v61 = vsel %vm739_vm9, %v733_v58, %v639_v51 }
  0xcd   : > { %v734_v13 = vsel %vm730_vm8, %v725_v12, %v616_v50 }
  0xcf   : > { %v537_v55 = vpop.permute.xlu1 %536 }
  0xd0   : > { %v507_v54 = vpop.permute.xlu0 %506  ;;  %v717_v33 = vsel %vm712_vm6, %v708_v27, %v537_v55  ;;  %v3594_v27 = vld [vmem:[%s4624_s6] ss:$0 sm:$0xff] }
  0xd1   : > { %v709_v41 = vsel %vm703_vm5, %v700_v29, %v507_v54 }
  0xd3   : > { %v667_v1 = vpop.permute.xlu1 %666 }
  0xd4   : > { %v641_v62 = vpop.permute.xlu0 %640  ;;  %v751_v19 = vsel %vm748_vm10, %v742_v61, %v667_v1  ;;  %v1084_v1 = vrot.slane %v3557_v56, 1 }
  0xd5   : > { %2837 = vmatprep.mubr.msk.f32.mxu0 %vm766_vm11, %v751_v19  ;;  %v743_v14 = vsel %vm739_vm9, %v734_v13, %v641_v62  ;;  %v3561_v62 = vld [vmem:[#allocation2 + $0x90] sm:$0xff]  ;;  %v1085_v19 = vrot.slane %v1048_v57, 1 }
  0xd6   : > { %1276 = vrot.lane.b32.xlu1 %v3561_v62, %s3093_s17 }
  0xd7   : > { %v539_v8 = vpop.permute.xlu1 %538  ;;  %v1086_v10 = vsel %vm439_vm0, %v1084_v1, %v1085_v19 }
  0xd8   : > { %v412_v6 = vpop.permute.xlu0 %411  ;;  %v718_v46 = vsel %vm712_vm6, %v709_v41, %v539_v8  ;;  %v1287_v8 = vrot.slane %v3561_v62, 1  ;;  %1108 = vrot.lane.b32.xlu0 %v1086_v10, %s3086_s20 }
  0xd9   : > { %v693_v54 = vsel %vm686_vm1, %v3349_v11, %v412_v6  ;;  %v3568_v11 = vld [vmem:[#allocation2 + $0x98] sm:$0x3] }
  0xda   : > { %v1288_v12 = vrot.slane %v3568_v11, 1 }
  0xdb   : > { %v669_v17 = vpop.permute.xlu1 %668 }
  0xdc   : > { %v593_v16 = vpop.permute.xlu0 %592  ;;  %v752_v30 = vsel %vm748_vm10, %v743_v14, %v669_v17  ;;  %v1289_v17 = vsel %vm439_vm0, %v1287_v8, %v1288_v12  ;;  %v1414_v8 = vld [vmem:[%s4621_s3 + $0x28] sm:$0xff] }
  0xdd   : > { %2838 = vmatmul.mubr.msk.f32.gmra.mxu0 %vm766_vm11, %v752_v30  ;;  %v726_v34 = vsel %vm721_vm7, %v717_v33, %v593_v16  ;;  %v1133_v30 = vrot.slane %v3557_v56, 2  ;;  %1304 = vrot.lane.b32.xlu1 %v1289_v17, %s3094_s18  ;;  %v1412_v17 = vld [vmem:[%s4621_s3 + $0x18] sm:$0xff] }
  0xdf   : > { %v477_v5 = vpop.permute.xlu1 %476 }
  0xe0   : > { %v414_v63 = vpop.permute.xlu0 %413  ;;  %v701_v58 = vsel %vm277_vm3, %v693_v54, %v477_v5 }
  0xe1   : > { %v694_v55 = vsel %vm686_vm1, %v3365_v23, %v414_v63  ;;  %v1134_v63 = vrot.slane %v1048_v57, 2 }
  0xe3   : > { %v618_v15 = vpop.permute.xlu1 %617 }
  0xe4   : > { %v595_v18 = vpop.permute.xlu0 %594  ;;  %v735_v7 = vsel %vm730_vm8, %v726_v34, %v618_v15 }
  0xe5   : > { %v727_v48 = vsel %vm721_vm7, %v718_v46, %v595_v18 }
  0xe7   : > { %v509_v2 = vpop.permute.xlu1 %508 }
  0xe8   : > { %v479_v20 = vpop.permute.xlu0 %478  ;;  %v710_v60 = vsel %vm703_vm5, %v701_v58, %v509_v2 }
  0xe9   : > { %v702_v61 = vsel %vm277_vm3, %v694_v55, %v479_v20 }
  0xeb   : > { %v643_v24 = vpop.permute.xlu1 %642 }
  0xec   : > { %v620_v22 = vpop.permute.xlu0 %619  ;;  %v744_v35 = vsel %vm739_vm9, %v735_v7, %v643_v24  ;;  %v1135_v24 = vsel %vm1132_vm12, %v1133_v30, %v1134_v63  ;;  %v1411_v63 = vld [vmem:[%s4621_s3 + $0x10] sm:$0xff] }
  0xed   : > { %v736_v50 = vsel %vm730_vm8, %v727_v48, %v620_v22  ;;  %1157 = vrot.lane.b32.xlu0 %v1135_v24, %s3087_s21  ;;  %v917_v48 = vld [vmem:[%s4620_s2] sm:$0xf] }
  0xee   : > { %2846 = vmatprep.subr.msk.mxu1 %vm791_vm2, %v917_v48 }
  0xef   : > { %v541_v31 = vpop.permute.xlu1 %540  ;;  %2847 = vmatpush3.msk.msra.mxu1 %vm791_vm2, %v917_v48  ;;  %vm1422_vm2 = vcmask 588800  }
  0xf0   : > { %v511_v28 = vpop.permute.xlu0 %510  ;;  %v719_v23 = vsel %vm712_vm6, %v710_v60, %v541_v31  ;;  %2849 = vmatmul.mubr.msk.f32.vlgmr.msra.gmra.mxu1 %vm686_vm1, %v3233_v21  ;;  %v1417_v60 = vld [vmem:[%s4621_s3 + $0x40] sm:$0xff] }
  0xf1   : > { %v711_v0 = vsel %vm703_vm5, %v702_v61, %v511_v28  ;;  %2851 = vmatprep.mubr.msk.f32.mxu1 %vm686_vm1, %v3284_v42  ;;  %2860 = vmatprep.subr.mxu1 %v1417_v60 }
  0xf2   : > { %2861 = vmatpush3.msra.mxu1 %v1417_v60 }
  0xf3   : > { %v671_v37 = vpop.permute.xlu1 %670 }
  0xf4   : > { %v645_v36 = vpop.permute.xlu0 %644  ;;  %v753_v39 = vsel %vm748_vm10, %v744_v35, %v671_v37  ;;  %2852 = vmatmul.mubr.msk.f32.gmra.mxu1 %vm686_vm1, %v3298_v47 }
  0xf5   : > { %2840 = vmatprep.mubr.msk.f32.mxu0 %vm766_vm11, %v753_v39  ;;  %v745_v51 = vsel %vm739_vm9, %v736_v50, %v645_v36  ;;  %2854 = vmatprep.mubr.msk.f32.mxu1 %vm686_vm1, %v3335_v4 }
  0xf7   : > { %v597_v44 = vpop.permute.xlu1 %596 }
  0xf8   : > { %v543_v43 = vpop.permute.xlu0 %542  ;;  %v728_v14 = vsel %vm721_vm7, %v719_v23, %v597_v44  ;;  %2855 = vmatmul.mubr.msk.f32.gmra.mxu1 %vm686_vm1, %v3346_v9  ;;  %v1416_v23 = vld [vmem:[%s4621_s3 + $0x38] sm:$0xff] }
  0xf9   : > { %v720_v13 = vsel %vm712_vm6, %v711_v0, %v543_v43  ;;  %2857 = vmatprep.mubr.msk.f32.mxu1 %vm686_vm1, %v3388_v32  ;;  %2862 = vmatprep.subr.mxu1 %v1416_v23 }
  0xfa   : > { %2863 = vmatpush3.msra.mxu1 %v1416_v23 }
  0xfb   : > { %v599_v53 = vpop.permute.xlu1 %598 }
  0xfc   : > { %v673_v52 = vpop.permute.xlu0 %672  ;;  %v729_v16 = vsel %vm721_vm7, %v720_v13, %v599_v53  ;;  %2858 = vmatmul.mubr.msk.f32.gmra.mxu1 %vm686_vm1, %v3398_v38  ;;  %vm1400_vm1 = vcmask 523264  }
  0xfd   : > { %v754_v59 = vsel %vm748_vm10, %v745_v51, %v673_v52 }
  0xfe   : > { %2841 = vmatmul.mubr.msk.f32.gmra.mxu0 %vm766_vm11, %v754_v59 }
  0xff   : > { %v624_v45 = vpop.permute.xlu1 %623 }
 0x100   : > { %v622_v40 = vpop.permute.xlu0 %621  ;;  %v738_v18 = vsel %vm730_vm8, %v729_v16, %v624_v45  ;;  %v1413_v16 = vld [vmem:[%s4621_s3 + $0x20] sm:$0xff] }
 0x101   : > { %v737_v5 = vsel %vm730_vm8, %v728_v14, %v622_v40 }
 0x103   : > { %v649_v6 = vpop.permute.xlu1 %648 }
 0x104   : > { %v647_v3 = vpop.permute.xlu0 %646  ;;  %v747_v20 = vsel %vm739_vm9, %v738_v18, %v649_v6  ;;  %v1410_v18 = vld [vmem:[%s4621_s3 + $0x8] sm:$0xff] }
 0x105   : > { %v746_v15 = vsel %vm739_vm9, %v737_v5, %v647_v3  ;;  %v1415_v3 = vld [vmem:[%s4621_s3 + $0x30] sm:$0xff] }
 0x106   : > { %2864 = vmatprep.subr.mxu1 %v1415_v3 }
 0x107   : > { %v677_v22 = vpop.permute.xlu1 %676  ;;  %2865 = vmatpush3.msra.mxu1 %v1415_v3  ;;  %v1314_v3 = vrot.slane %v3561_v62, 2 }
 0x108   : > { %v675_v2 = vpop.permute.xlu0 %674  ;;  %v756_v26 = vsel %vm748_vm10, %v747_v20, %v677_v22  ;;  %2866 = vmatprep.subr.mxu1 %v1414_v8  ;;  %v1409_v22 = vld [vmem:[%s4621_s3] sm:$0xff] }
 0x109   : > { %v755_v25 = vsel %vm748_vm10, %v746_v15, %v675_v2  ;;  %2867 = vmatpush3.msra.mxu1 %v1414_v8 }
 0x10a   : > { %2843 = vmatprep.mubr.msk.f32.mxu0 %vm766_vm11, %v755_v25  ;;  %2868 = vmatprep.subr.mxu1 %v1413_v16 }
 0x10b   : > { %2844 = vmatmul.mubr.msk.f32.gmra.mxu0 %vm766_vm11, %v756_v26  ;;  %2869 = vmatpush3.msra.mxu1 %v1413_v16 }
 0x10c   : > { %2870 = vmatprep.subr.mxu1 %v1412_v17 }
 0x10d   : > { %2871 = vmatpush3.msra.mxu1 %v1412_v17 }
 0x10e   : > { %2872 = vmatprep.subr.mxu1 %v1411_v63 }
 0x10f   : > { %2873 = vmatpush3.msra.mxu1 %v1411_v63 }
 0x110   : > { %2874 = vmatprep.subr.mxu1 %v1410_v18 }
 0x111   : > { %2875 = vmatpush3.msra.mxu1 %v1410_v18 }
 0x112   : > { %2876 = vmatprep.subr.mxu1 %v1409_v22 }
 0x113   : > { %2877 = vmatpush3.msra.mxu1 %v1409_v22 }
 0x17d   : > { %v2836_v28 = vpop.f32.mrf.mxu0 }
 0x17e   : > { %v867_v31 = vadd.f32 %v2836_v28, %v3594_v27 }
 0x17f   : > { %v861_v33 = vpop.f32.mrf.mxu0 }
 0x180   : > { %v901_v34 = vmax.f32 %v867_v31, 0.0  ;;  %v862_v7 = vadd.f32 %v3594_v27, %v861_v33 }
 0x182   : > { %910 = vst.msk [vmem:[#allocation2 + $0x21] sm:$0xff] %vm277_vm3, %v901_v34  ;;  %v900_v35 = vmax.f32 %v862_v7, 0.0 }
 0x184   : > { %909 = vst.msk [vmem:[#allocation2 + $0x11] sm:$0xff] %vm277_vm3, %v900_v35 }
 0x189   : > { %v3600_v36 = vld [vmem:[#allocation2 + $0x20] sm:$0xff]  ;;  %v1052_v37 = vld [vmem:[#allocation2 + $0x28] sm:$0x3] }
 0x18a   : > { %1184 = vrot.lane.b32.xlu1 %v3600_v36, %s3089_s8  ;;  %v1090_v49 = vrot.slane %v3600_v36, 1  ;;  %v1091_v29 = vrot.slane %v1052_v37, 1  ;;  %v1139_v43 = vrot.slane %v3600_v36, 2  ;;  %v1140_v44 = vrot.slane %v1052_v37, 2 }
 0x18b   : > { %v3604_v39 = vld [vmem:[#allocation2 + $0x10] sm:$0xff]  ;;  %v1050_v45 = vld [vmem:[#allocation2 + $0x18] sm:$0x3] }
 0x18c   : > { %1182 = vrot.lane.b32.xlu0 %v3604_v39, %s3089_s8  ;;  %v1092_v41 = vsel %vm439_vm0, %v1090_v49, %v1091_v29  ;;  %v1141_v46 = vsel %vm1132_vm12, %v1139_v43, %v1140_v44  ;;  %v1087_v42 = vrot.slane %v3604_v39, 1  ;;  %v1088_v54 = vrot.slane %v1050_v45, 1 }
 0x18d   : > { %v1136_v4 = vrot.slane %v3604_v39, 2  ;;  %v1137_v9 = vrot.slane %v1050_v45, 2 }
 0x18e   : > { %1262 = vrot.lane.b32.xlu1 %v3600_v36, %s3093_s17  ;;  %v1089_v47 = vsel %vm439_vm0, %v1087_v42, %v1088_v54  ;;  %v3746_v42 = vpop.permute.xlu1 %1276 }
 0x18f   : > { %v1138_v55 = vsel %vm1132_vm12, %v1136_v4, %v1137_v9 }
 0x190   : > { %1212 = vrot.lane.b32.xlu0 %v1092_v41, %s3091_s14 }
 0x192   : > { %1112 = vrot.lane.b32.xlu1 %v1092_v41, %s3086_s20 }
 0x194   : > { %1239 = vrot.lane.b32.xlu0 %v1141_v46, %s3095_s15 }
 0x196   : > { %1161 = vrot.lane.b32.xlu1 %v1141_v46, %s3087_s21 }
 0x19a   : > { %1290 = vrot.lane.b32.xlu1 %v1092_v41, %s3094_s18 }
 0x19d   : > { %v2839_v50 = vpop.f32.mrf.mxu0 }
 0x19e   : > { %v877_v51 = vadd.f32 %v2839_v50, %v3594_v27  ;;  %1317 = vrot.lane.b32.xlu1 %v1141_v46, %s3096_s29 }
 0x19f   : > { %v871_v52 = vpop.f32.mrf.mxu0 }
 0x1a0   : > { %v903_v53 = vmax.f32 %v877_v51, 0.0  ;;  %v872_v59 = vadd.f32 %v3594_v27, %v871_v52 }
 0x1a2   : > { %912 = vst.msk [vmem:[#allocation2 + $0x41] sm:$0xff] %vm277_vm3, %v903_v53  ;;  %v902_v40 = vmax.f32 %v872_v59, 0.0 }
 0x1a4   : > { %911 = vst.msk [vmem:[#allocation2 + $0x31] sm:$0xff] %vm277_vm3, %v902_v40 }
 0x1a9   : > { %v3641_v21 = vld [vmem:[#allocation2 + $0x40] sm:$0xff]  ;;  %v1056_v32 = vld [vmem:[#allocation2 + $0x48] sm:$0x3] }
 0x1aa   : > { %1266 = vrot.lane.b32.xlu1 %v3641_v21, %s3093_s17  ;;  %1188 = vrot.lane.b32.xlu0 %v3641_v21, %s3089_s8  ;;  %v1096_v58 = vrot.slane %v3641_v21, 1  ;;  %v1097_v61 = vrot.slane %v1056_v32, 1  ;;  %v1145_v1 = vrot.slane %v3641_v21, 2  ;;  %v1146_v19 = vrot.slane %v1056_v32, 2 }
 0x1ab   : > { %v3655_v57 = vld [vmem:[#allocation2 + $0x30] sm:$0xff]  ;;  %v1054_v5 = vld [vmem:[#allocation2 + $0x38] sm:$0x3] }
 0x1ac   : > { %v1098_v38 = vsel %vm439_vm0, %v1096_v58, %v1097_v61  ;;  %v1147_v0 = vsel %vm1132_vm12, %v1145_v1, %v1146_v19  ;;  %v1093_v20 = vrot.slane %v3655_v57, 1  ;;  %v1094_v2 = vrot.slane %v1054_v5, 1 }
 0x1ad   : > { %v1142_v28 = vrot.slane %v3655_v57, 2  ;;  %v1143_v7 = vrot.slane %v1054_v5, 2 }
 0x1ae   : > { %1110 = vrot.lane.b32.xlu1 %v1089_v47, %s3086_s20  ;;  %1210 = vrot.lane.b32.xlu0 %v1089_v47, %s3091_s14  ;;  %v1095_v34 = vsel %vm439_vm0, %v1093_v20, %v1094_v2 }
 0x1af   : > { %v1144_v37 = vsel %vm1132_vm12, %v1142_v28, %v1143_v7 }
 0x1b2   : > { %1159 = vrot.lane.b32.xlu1 %v1138_v55, %s3087_s21  ;;  %1264 = vrot.lane.b32.xlu0 %v3655_v57, %s3093_s17 }
 0x1b6   : > { %1237 = vrot.lane.b32.xlu1 %v1138_v55, %s3095_s15  ;;  %1116 = vrot.lane.b32.xlu0 %v1098_v38, %s3086_s20  ;;  %v3756_v55 = vpop.permute.xlu1 %1304 }
 0x1ba   : > { %1243 = vrot.lane.b32.xlu0 %v1147_v0, %s3095_s15  ;;  %1186 = vrot.lane.b32.xlu1 %v3655_v57, %s3089_s8 }
 0x1be   : > { %v2842_v6 = vpop.f32.mrf.mxu0  ;;  %1216 = vrot.lane.b32.xlu1 %v1098_v38, %s3091_s14 }
 0x1bf   : > { %v887_v10 = vadd.f32 %v2842_v6, %v3594_v27  ;;  %v1315_v6 = vrot.slane %v3568_v11, 2 }
 0x1c0   : > { %v881_v12 = vpop.f32.mrf.mxu0 }
 0x1c1   : > { %v905_v13 = vmax.f32 %v887_v10, 0.0  ;;  %v882_v14 = vadd.f32 %v3594_v27, %v881_v12  ;;  %v1316_v16 = vsel %vm1132_vm12, %v1314_v3, %v1315_v6 }
 0x1c2   : > { %1165 = vrot.lane.b32.xlu1 %v1147_v0, %s3087_s21 }
 0x1c3   : > { %914 = vst.msk [vmem:[#allocation2 + $0x61] sm:$0xff] %vm277_vm3, %v905_v13  ;;  %v904_v30 = vmax.f32 %v882_v14, 0.0  ;;  %v1109_v14 = vpop.permute.xlu0 %1108 }
 0x1c5   : > { %913 = vst.msk [vmem:[#allocation2 + $0x51] sm:$0xff] %vm277_vm3, %v904_v30 }
 0x1c6   : > { %1294 = vrot.lane.b32.xlu1 %v1098_v38, %s3094_s18 }
 0x1c7   : > { %v1158_v62 = vpop.permute.xlu0 %1157 }
 0x1ca   : > { %v3700_v15 = vld [vmem:[#allocation2 + $0x60] sm:$0xff]  ;;  %1321 = vrot.lane.b32.xlu1 %v1147_v0, %s3096_s29 }
 0x1cb   : > { %1192 = vrot.lane.b32.xlu0 %v3700_v15, %s3089_s8  ;;  %v2845_v24 = vpop.f32.mrf.mxu0  ;;  %v1102_v29 = vrot.slane %v3700_v15, 1  ;;  %v1151_v44 = vrot.slane %v3700_v15, 2 }
 0x1cc   : > { %v897_v25 = vadd.f32 %v2845_v24, %v3594_v27  ;;  %v3723_v49 = vld [vmem:[#allocation2 + $0x50] sm:$0xff]  ;;  %v1058_v50 = vld [vmem:[#allocation2 + $0x58] sm:$0x3] }
 0x1cd   : > { %v891_v26 = vpop.f32.mrf.mxu0  ;;  %v1099_v52 = vrot.slane %v3723_v49, 1  ;;  %v1100_v53 = vrot.slane %v1058_v50, 1  ;;  %v1148_v40 = vrot.slane %v3723_v49, 2  ;;  %v1149_v45 = vrot.slane %v1058_v50, 2 }
 0x1ce   : > { %v907_v31 = vmax.f32 %v897_v25, 0.0  ;;  %v892_v33 = vadd.f32 %v3594_v27, %v891_v26  ;;  %1270 = vrot.lane.b32.xlu1 %v3700_v15, %s3093_s17  ;;  %v1060_v27 = vld [vmem:[#allocation2 + $0x68] sm:$0x3]  ;;  %v1341_v26 = vsel %vm277_vm3, %v3557_v56, %v1109_v14 }
 0x1cf   : > { %1114 = vrot.lane.b32.xlu0 %v1095_v34, %s3086_s20  ;;  %v1103_v41 = vrot.slane %v1060_v27, 1  ;;  %v1152_v46 = vrot.slane %v1060_v27, 2  ;;  %v1101_v59 = vsel %vm439_vm0, %v1099_v52, %v1100_v53  ;;  %v1150_v54 = vsel %vm1132_vm12, %v1148_v40, %v1149_v45 }
 0x1d0   : > { %916 = vst.msk [vmem:[#allocation2 + $0x81] sm:$0xff] %vm277_vm3, %v907_v31  ;;  %v906_v35 = vmax.f32 %v892_v33, 0.0  ;;  %v1349_v28 = vsel %vm712_vm6, %v1341_v26, %v1158_v62 }
 0x1d1   : > { %v1104_v43 = vsel %vm439_vm0, %v1102_v29, %v1103_v41  ;;  %v1153_v48 = vsel %vm1132_vm12, %v1151_v44, %v1152_v46 }
 0x1d2   : > { %915 = vst.msk [vmem:[#allocation2 + $0x71] sm:$0xff] %vm277_vm3, %v906_v35  ;;  %1214 = vrot.lane.b32.xlu1 %v1095_v34, %s3091_s14 }
 0x1d3   : > { %1163 = vrot.lane.b32.xlu0 %v1144_v37, %s3087_s21 }
 0x1d6   : > { %1319 = vrot.lane.b32.xlu1 %v1144_v37, %s3096_s29 }
 0x1d7   : > { %1292 = vrot.lane.b32.xlu0 %v1095_v34, %s3094_s18  ;;  %v1063_v51 = vld [vmem:[#allocation2 + $0x80] sm:$0xff]  ;;  %v1064_v47 = vld [vmem:[#allocation2 + $0x88] sm:$0x3] }
 0x1d8   : > { %v1234_v4 = vrot.slane %v1063_v51, 2  ;;  %v1235_v32 = vrot.slane %v1064_v47, 2  ;;  %v1207_v10 = vrot.slane %v1063_v51, 1  ;;  %v1208_v13 = vrot.slane %v1064_v47, 1 }
 0x1d9   : > { %v3751_v9 = vld [vmem:[#allocation2 + $0x70] sm:$0xff]  ;;  %v1062_v58 = vld [vmem:[#allocation2 + $0x78] sm:$0x3] }
 0x1da   : > { %1190 = vrot.lane.b32.xlu1 %v3723_v49, %s3089_s8  ;;  %v1236_v61 = vsel %vm1132_vm12, %v1234_v4, %v1235_v32  ;;  %v1105_v38 = vrot.slane %v3751_v9, 1  ;;  %v1106_v1 = vrot.slane %v1062_v58, 1  ;;  %v1154_v0 = vrot.slane %v3751_v9, 2 }
 0x1db   : > { %1241 = vrot.lane.b32.xlu0 %v1144_v37, %s3095_s15  ;;  %v1155_v23 = vrot.slane %v1062_v58, 2  ;;  %v1209_v17 = vsel %vm439_vm0, %v1207_v10, %v1208_v13 }
 0x1dc   : > { %v1107_v60 = vsel %vm439_vm0, %v1105_v38, %v1106_v1 }
 0x1dd   : > { %v1156_v12 = vsel %vm1132_vm12, %v1154_v0, %v1155_v23 }
 0x1de   : > { %1220 = vrot.lane.b32.xlu1 %v1104_v43, %s3091_s14 }
 0x1df   : > { %1268 = vrot.lane.b32.xlu0 %v3723_v49, %s3093_s17 }
 0x1e2   : > { %1169 = vrot.lane.b32.xlu1 %v1153_v48, %s3087_s21 }
 0x1e3   : > { %1120 = vrot.lane.b32.xlu0 %v1104_v43, %s3086_s20 }
 0x1e6   : > { %1298 = vrot.lane.b32.xlu1 %v1104_v43, %s3094_s18 }
 0x1e7   : > { %1247 = vrot.lane.b32.xlu0 %v1153_v48, %s3095_s15 }
 0x1ea   : > { %1325 = vrot.lane.b32.xlu1 %v1153_v48, %s3096_s29 }
 0x1eb   : > { %1196 = vrot.lane.b32.xlu0 %v1063_v51, %s3089_s8 }
 0x1ee   : > { %1218 = vrot.lane.b32.xlu1 %v1101_v59, %s3091_s14 }
 0x1ef   : > { %1274 = vrot.lane.b32.xlu0 %v1063_v51, %s3093_s17 }
 0x1f2   : > { %1323 = vrot.lane.b32.xlu1 %v1150_v54, %s3096_s29 }
 0x1f3   : > { %1118 = vrot.lane.b32.xlu0 %v1101_v59, %s3086_s20 }
 0x1f6   : > { %1194 = vrot.lane.b32.xlu1 %v3751_v9, %s3089_s8 }
 0x1f7   : > { %1167 = vrot.lane.b32.xlu0 %v1150_v54, %s3087_s21 }
 0x1fa   : > { %1251 = vrot.lane.b32.xlu1 %v1236_v61, %s3095_s15 }
 0x1fb   : > { %1296 = vrot.lane.b32.xlu0 %v1101_v59, %s3094_s18 }
 0x1fc   : > { %v3762_v19 = vpop.permute.xlu1 %1184 }
 0x1fe   : > { %1222 = vrot.lane.b32.xlu1 %v1107_v60, %s3091_s14  ;;  %v1183_v63 = vpop.permute.xlu0 %1182 }
 0x1ff   : > { %1245 = vrot.lane.b32.xlu0 %v1150_v54, %s3095_s15  ;;  %v1357_v34 = vsel %vm730_vm8, %v1349_v28, %v1183_v63 }
 0x200   : > { %v1263_v8 = vpop.permute.xlu1 %1262 }
 0x202   : > { %1249 = vrot.lane.b32.xlu1 %v1156_v12, %s3095_s15  ;;  %v1213_v18 = vpop.permute.xlu0 %1212 }
 0x203   : > { %1272 = vrot.lane.b32.xlu0 %v3751_v9, %s3093_s17 }
 0x204   : > { %v1113_v30 = vpop.permute.xlu1 %1112 }
 0x206   : > { %1331 = vrot.lane.b32.xlu1 %v1316_v16, %s3096_s29  ;;  %v1240_v2 = vpop.permute.xlu0 %1239 }
 0x207   : > { %1224 = vrot.lane.b32.xlu0 %v1209_v17, %s3091_s14 }
 0x208   : > { %v1162_v11 = vpop.permute.xlu1 %1161 }
 0x20b   : > { %1302 = vrot.lane.b32.xlu0 %v1209_v17, %s3094_s18 }
 0x20c   : > { %v1291_v5 = vpop.permute.xlu1 %1290 }
 0x20f   : > { %1122 = vrot.lane.b32.xlu0 %v1107_v60, %s3086_s20 }
 0x210   : > { %v1318_v20 = vpop.permute.xlu1 %1317 }
 0x213   : > { %1171 = vrot.lane.b32.xlu0 %v1156_v12, %s3087_s21 }
 0x217   : > { %1300 = vrot.lane.b32.xlu0 %v1107_v60, %s3094_s18  ;;  %v1343_v60 = vsel %vm277_vm3, %v3600_v36, %v1113_v30 }
 0x21b   : > { %1327 = vrot.lane.b32.xlu0 %v1156_v12, %s3096_s29 }
 0x21c   : > { %v1267_v22 = vpop.permute.xlu1 %1266  ;;  %v3784_v24 = vpop.permute.xlu0 %1188 }
 0x21f   : > { %1329 = vrot.lane.b32.xlu0 %v1236_v61, %s3096_s29 }
 0x220   : > { %v1111_v25 = vpop.permute.xlu1 %1110  ;;  %v1211_v33 = vpop.permute.xlu0 %1210 }
 0x221   : > { %v1365_v7 = vsel %vm748_vm10, %v1357_v34, %v1211_v33  ;;  %v1342_v52 = vsel %vm277_vm3, %v3604_v39, %v1111_v25 }
 0x224   : > { %v1160_v31 = vpop.permute.xlu1 %1159  ;;  %v1265_v29 = vpop.permute.xlu0 %1264 }
 0x225   : > { %v1350_v53 = vsel %vm712_vm6, %v1342_v52, %v1160_v31 }
 0x226   : > { %v1358_v45 = vsel %vm730_vm8, %v1350_v53, %v3762_v19  ;;  %v1351_v19 = vsel %vm712_vm6, %v1343_v60, %v1162_v11 }
 0x227   : > { %v1366_v4 = vsel %vm748_vm10, %v1358_v45, %v1213_v18  ;;  %v3827_v18 = vpop.f32.mrf.mxu1 }
 0x228   : > { %v1238_v35 = vpop.permute.xlu1 %1237  ;;  %v3796_v46 = vpop.permute.xlu0 %1116  ;;  %v1375_v61 = vsel %vm1373_vm13, %v1366_v4, %v1240_v2 }
 0x229   : > { %v1374_v37 = vsel %vm1373_vm13, %v1365_v7, %v1238_v35  ;;  %v1384_v39 = vsel %vm1382_vm14, %v1375_v61, %v1265_v29  ;;  %v3833_v25 = vpop.f32.mrf.mxu1  ;;  %v3845_v35 = vld [vmem:[%s4624_s6 + $0x1] ss:$0 sm:$0xff] }
 0x22a   : > { %v1383_v27 = vsel %vm1382_vm14, %v1374_v37, %v1263_v8 }
 0x22b   : > { %v1392_v56 = vsel %vm1391_vm15, %v1383_v27, %v1291_v5  ;;  %v3836_v28 = vpop.f32.mrf.mxu1 }
 0x22c   : > { %v1187_v41 = vpop.permute.xlu1 %1186  ;;  %v1401_v43 = vsel %vm1400_vm1, %v1392_v56, %v1318_v20  ;;  %v1244_v50 = vpop.permute.xlu0 %1243 }
 0x22d   : > { %2878 = vmatprep.mubr.msk.f32.mxu1 %vm1422_vm2, %v1401_v43  ;;  %v1359_v3 = vsel %vm730_vm8, %v1351_v19, %v1187_v41  ;;  %v3840_v34 = vpop.f32.mrf.mxu1 }
 0x230   : > { %v1217_v44 = vpop.permute.xlu1 %1216 }
 0x234   : > { %v3798_v48 = vpop.permute.xlu1 %1165 }
 0x238   : > { %v1295_v51 = vpop.permute.xlu1 %1294 }
 0x23c   : > { %v1322_v40 = vpop.permute.xlu1 %1321 }
 0x23d   : > { %v3803_v59 = vpop.permute.xlu0 %1192 }
 0x240   : > { %v3807_v47 = vpop.permute.xlu1 %1270 }
 0x241   : > { %v1115_v54 = vpop.permute.xlu0 %1114 }
 0x242   : > { %v1344_v2 = vsel %vm277_vm3, %v3655_v57, %v1115_v54  ;;  %v2856_v57 = vpop.f32.mrf.mxu1 }
 0x243   : > { %v3849_v56 = vadd.f32 %v2856_v57, %v3845_v35 }
 0x244   : > { %v1215_v58 = vpop.permute.xlu1 %1214  ;;  %v1028_v29 = vpop.f32.mrf.mxu1 }
 0x245   : > { %v1164_v32 = vpop.permute.xlu0 %1163  ;;  %v1367_v6 = vsel %vm748_vm10, %v1359_v3, %v1215_v58  ;;  %v3852_v41 = vadd.f32 %v3845_v35, %v1028_v29  ;;  %v3907_v29 = vld [vmem:[#allocation3] sm:$0xff] }
 0x246   : > { %v1352_v26 = vsel %vm712_vm6, %v1344_v2, %v1164_v32  ;;  %v2859_v43 = vpop.f32.mrf.mxu1 }
 0x247   : > { %v1360_v33 = vsel %vm730_vm8, %v1352_v26, %v3784_v24  ;;  %v3857_v53 = vadd.f32 %v2859_v43, %v3845_v35  ;;  %v3911_v43 = vld [vmem:[#allocation3 + $0x90] sm:$0xff] }
 0x248   : > { %v1320_v1 = vpop.permute.xlu1 %1319  ;;  %v1368_v37 = vsel %vm748_vm10, %v1360_v33, %v1217_v44  ;;  %v1345_v44 = vsel %vm277_vm3, %v3641_v21, %v3796_v46  ;;  %1805 = vrot.lane.b32.xlu1 %v3911_v43, %s3093_s17 }
 0x249   : > { %v1293_v38 = vpop.permute.xlu0 %1292  ;;  %v1377_v24 = vsel %vm1373_vm13, %v1368_v37, %v1244_v50  ;;  %v1353_v54 = vsel %vm712_vm6, %v1345_v44, %v3798_v48 }
 0x24a   : > { %v1393_v0 = vsel %vm1391_vm15, %v1384_v39, %v1293_v38 }
 0x24b   : > { %v1402_v23 = vsel %vm1400_vm1, %v1393_v0, %v1320_v1 }
 0x24c   : > { %2879 = vmatmul.mubr.msk.f32.vlgmr.msra.gmra.mxu1 %vm1422_vm2, %v1402_v23  ;;  %v1191_v10 = vpop.permute.xlu1 %1190 }
 0x24d   : > { %v1242_v8 = vpop.permute.xlu0 %1241  ;;  %v1361_v50 = vsel %vm730_vm8, %v1353_v54, %v1191_v10 }
 0x24e   : > { %v1376_v12 = vsel %vm1373_vm13, %v1367_v6, %v1242_v8 }
 0x24f   : > { %v1385_v13 = vsel %vm1382_vm14, %v1376_v12, %v1267_v22 }
 0x250   : > { %v1394_v36 = vsel %vm1391_vm15, %v1385_v13, %v1295_v51  ;;  %v1221_v16 = vpop.permute.xlu1 %1220 }
 0x251   : > { %v1269_v14 = vpop.permute.xlu0 %1268  ;;  %v1403_v17 = vsel %vm1400_vm1, %v1394_v36, %v1322_v40 }
 0x252   : > { %2881 = vmatprep.mubr.msk.f32.mxu1 %vm1422_vm2, %v1403_v17  ;;  %v1386_v51 = vsel %vm1382_vm14, %v1377_v24, %v1269_v14 }
 0x254   : > { %v1170_v62 = vpop.permute.xlu1 %1169 }
 0x255   : > { %v1121_v30 = vpop.permute.xlu0 %1120 }
 0x256   : > { %v1347_v13 = vsel %vm277_vm3, %v3700_v15, %v1121_v30 }
 0x258   : > { %v1299_v63 = vpop.permute.xlu1 %1298 }
 0x259   : > { %v3825_v11 = vpop.permute.xlu0 %1247 }
 0x25c   : > { %v1326_v22 = vpop.permute.xlu1 %1325 }
 0x25d   : > { %v1197_v5 = vpop.permute.xlu0 %1196 }
 0x260   : > { %v1219_v7 = vpop.permute.xlu1 %1218 }
 0x261   : > { %v3829_v20 = vpop.permute.xlu0 %1274  ;;  %v1369_v32 = vsel %vm748_vm10, %v1361_v50, %v1219_v7 }
 0x264   : > { %v1324_v40 = vpop.permute.xlu1 %1323 }
 0x265   : > { %v1119_v31 = vpop.permute.xlu0 %1118 }
 0x266   : > { %v1346_v19 = vsel %vm277_vm3, %v3723_v49, %v1119_v31 }
 0x268   : > { %v1195_v48 = vpop.permute.xlu1 %1194 }
 0x269   : > { %v1168_v27 = vpop.permute.xlu0 %1167 }
 0x26a   : > { %v1354_v3 = vsel %vm712_vm6, %v1346_v19, %v1168_v27 }
 0x26c   : > { %v1252_v0 = vpop.permute.xlu1 %1251 }
 0x26d   : > { %v1297_v52 = vpop.permute.xlu0 %1296 }
 0x26e   : > { %v1395_v45 = vsel %vm1391_vm15, %v1386_v51, %v1297_v52  ;;  %v1816_v52 = vrot.slane %v3911_v43, 1 }
 0x26f   : > { %v1404_v4 = vsel %vm1400_vm1, %v1395_v45, %v1324_v40  ;;  %v1662_v45 = vrot.slane %v3907_v29, 2 }
 0x270   : > { %2882 = vmatmul.mubr.msk.f32.gmra.mxu1 %vm1422_vm2, %v1404_v4  ;;  %v1223_v6 = vpop.permute.xlu1 %1222 }
 0x271   : > { %v1246_v58 = vpop.permute.xlu0 %1245 }
 0x272   : > { %v1378_v61 = vsel %vm1373_vm13, %v1369_v32, %v1246_v58  ;;  %v3928_v32 = vpop.f32.mrf.mxu1  ;;  %v3933_v58 = vld [vmem:[%s4624_s6 + $0x2] ss:$0 sm:$0xff] }
 0x273   : > { %v1387_v21 = vsel %vm1382_vm14, %v1378_v61, %v3807_v47  ;;  %v1362_v47 = vsel %vm730_vm8, %v1354_v3, %v3803_v59  ;;  %v1014_v61 = vadd.f32 %v3827_v18, %v3845_v35 }
 0x274   : > { %v1396_v46 = vsel %vm1391_vm15, %v1387_v21, %v1299_v63  ;;  %v1370_v49 = vsel %vm748_vm10, %v1362_v47, %v1221_v16  ;;  %v1355_v63 = vsel %vm712_vm6, %v1347_v13, %v1170_v62  ;;  %v1250_v2 = vpop.permute.xlu1 %1249 }
 0x275   : > { %v1273_v38 = vpop.permute.xlu0 %1272  ;;  %v1405_v39 = vsel %vm1400_vm1, %v1396_v46, %v1326_v22  ;;  %v1379_v22 = vsel %vm1373_vm13, %v1370_v49, %v3825_v11  ;;  %v1009_v46 = vadd.f32 %v3845_v35, %v3833_v25 }
 0x276   : > { %2884 = vmatprep.mubr.msk.f32.mxu1 %vm1422_vm2, %v1405_v39  ;;  %v1388_v15 = vsel %vm1382_vm14, %v1379_v22, %v1273_v38 }
 0x278   : > { %v1332_v7 = vpop.permute.xlu1 %1331 }
 0x279   : > { %v1225_v1 = vpop.permute.xlu0 %1224 }
 0x27d   : > { %v1303_v60 = vpop.permute.xlu0 %1302 }
 0x281   : > { %v1123_v23 = vpop.permute.xlu0 %1122 }
 0x282   : > { %v1348_v8 = vsel %vm277_vm3, %v3751_v9, %v1123_v23  ;;  %v1363_v9 = vsel %vm730_vm8, %v1355_v63, %v1195_v48 }
 0x283   : > { %v1371_v26 = vsel %vm748_vm10, %v1363_v9, %v1223_v6 }
 0x284   : > { %v1380_v30 = vsel %vm1373_vm13, %v1371_v26, %v1250_v2 }
 0x285   : > { %v1172_v10 = vpop.permute.xlu0 %1171  ;;  %v1389_v33 = vsel %vm1382_vm14, %v1380_v30, %v3829_v20  ;;  %v1614_v20 = vrot.slane %v3907_v29, 1 }
 0x286   : > { %v1356_v12 = vsel %vm712_vm6, %v1348_v8, %v1172_v10  ;;  %v1398_v57 = vsel %vm1391_vm15, %v1389_v33, %v1303_v60 }
 0x287   : > { %v1364_v36 = vsel %vm730_vm8, %v1356_v12, %v1197_v5 }
 0x288   : > { %v1372_v14 = vsel %vm748_vm10, %v1364_v36, %v1225_v1  ;;  %v1024_v36 = vadd.f32 %v3836_v28, %v3845_v35 }
 0x289   : > { %v1301_v17 = vpop.permute.xlu0 %1300  ;;  %v1381_v59 = vsel %vm1373_vm13, %v1372_v14, %v1252_v0 }
 0x28a   : > { %v1397_v16 = vsel %vm1391_vm15, %v1388_v15, %v1301_v17  ;;  %v1390_v5 = vsel %vm1382_vm14, %v1381_v59, %v3746_v42  ;;  %v1578_v42 = vld [vmem:[#allocation3 + $0x8] sm:$0x3]  ;;  %v1019_v17 = vadd.f32 %v3845_v35, %v3840_v34 }
 0x28b   : > { %v1399_v11 = vsel %vm1391_vm15, %v1390_v5, %v3756_v55  ;;  %v1615_v51 = vrot.slane %v1578_v42, 1  ;;  %v3917_v55 = vld [vmem:[#allocation3 + $0x98] sm:$0x3]  ;;  %v1663_v54 = vrot.slane %v1578_v42, 2  ;;  %v1942_v42 = vld [vmem:[%s4622_s4 + $0x40] sm:$0xff] }
 0x28c   : > { %v1408_v24 = vsel %vm1400_vm1, %v1399_v11, %v1332_v7  ;;  %v1817_v40 = vrot.slane %v3917_v55, 1  ;;  %2890 = vmatprep.subr.mxu0 %v1942_v42 }
 0x28d   : > { %v1328_v62 = vpop.permute.xlu0 %1327  ;;  %v1616_v44 = vsel %vm439_vm0, %v1614_v20, %v1615_v51  ;;  %v1664_v50 = vsel %vm1132_vm12, %v1662_v45, %v1663_v54  ;;  %2891 = vmatpush3.msra.mxu0 %v1942_v42  ;;  %v1939_v45 = vld [vmem:[%s4622_s4 + $0x28] sm:$0xff] }
 0x28e   : > { %v1406_v31 = vsel %vm1400_vm1, %v1397_v16, %v1328_v62  ;;  %1638 = vrot.lane.b32.xlu0 %v1616_v44, %s3086_s20  ;;  %v1818_v4 = vsel %vm439_vm0, %v1816_v52, %v1817_v40  ;;  %v1940_v44 = vld [vmem:[%s4622_s4 + $0x30] sm:$0xff] }
 0x28f   : > { %2885 = vmatmul.mubr.msk.f32.gmra.mxu1 %vm1422_vm2, %v1406_v31  ;;  %1833 = vrot.lane.b32.xlu1 %v1818_v4, %s3094_s18 }
 0x291   : > { %v1330_v37 = vpop.permute.xlu0 %1329 }
 0x292   : > { %v1407_v27 = vsel %vm1400_vm1, %v1398_v57, %v1330_v37  ;;  %1686 = vrot.lane.b32.xlu0 %v1664_v50, %s3087_s21 }
 0x293   : > { %2887 = vmatprep.mubr.msk.f32.mxu1 %vm1422_vm2, %v1407_v27 }
 0x294   : > { %2888 = vmatmul.mubr.msk.f32.gmra.mxu1 %vm1422_vm2, %v1408_v24  ;;  %v1941_v24 = vld [vmem:[%s4622_s4 + $0x38] sm:$0xff] }
 0x295   : > { %2892 = vmatprep.subr.mxu0 %v1941_v24 }
 0x296   : > { %2893 = vmatpush3.msra.mxu0 %v1941_v24 }
 0x297   : > { %2894 = vmatprep.subr.mxu0 %v1940_v44 }
 0x298   : > { %2895 = vmatpush3.msra.mxu0 %v1940_v44 }
 0x299   : > { %2896 = vmatprep.subr.mxu0 %v1939_v45 }
 0x29a   : > { %2897 = vmatpush3.msra.mxu0 %v1939_v45 }
 0x2ba   : > { %v4119_v24 = vpop.permute.xlu1 %1805 }
 0x30c   : > { %v2880_v21 = vpop.f32.mrf.mxu1 }
 0x30d   : > { %v1519_v38 = vadd.f32 %v2880_v21, %v3933_v58 }
 0x30e   : > { %v1513_v39 = vpop.f32.mrf.mxu1 }
 0x30f   : > { %v3940_v48 = vadd.f32 %v1519_v38, %v1014_v61  ;;  %v1514_v1 = vadd.f32 %v3933_v58, %v1513_v39  ;;  %v1937_v38 = vld [vmem:[%s4622_s4 + $0x18] sm:$0xff] }
 0x311   : > { %v1561_v60 = vmax.f32 %v3940_v48, 0.0  ;;  %v3944_v0 = vadd.f32 %v1514_v1, %v1009_v46  ;;  %v1039_v1 = vadd.f32 %v3845_v35, %v3928_v32  ;;  %v1936_v35 = vld [vmem:[%s4622_s4 + $0x10] sm:$0xff]  ;;  %v1935_v32 = vld [vmem:[%s4622_s4 + $0x8] sm:$0xff] }
 0x313   : > { %1570 = vst.msk [vmem:[#allocation3 + $0x21] sm:$0xff] %vm277_vm3, %v1561_v60  ;;  %v1560_v18 = vmax.f32 %v3944_v0, 0.0 }
 0x315   : > { %1569 = vst.msk [vmem:[#allocation3 + $0x11] sm:$0xff] %vm277_vm3, %v1560_v18 }
 0x31a   : > { %v3953_v25 = vld [vmem:[#allocation3 + $0x20] sm:$0xff]  ;;  %v1582_v19 = vld [vmem:[#allocation3 + $0x28] sm:$0x3] }
 0x31b   : > { %1713 = vrot.lane.b32.xlu1 %v3953_v25, %s3089_s8  ;;  %v1620_v3 = vrot.slane %v3953_v25, 1  ;;  %v1621_v6 = vrot.slane %v1582_v19, 1  ;;  %v1668_v8 = vrot.slane %v3953_v25, 2  ;;  %v1669_v10 = vrot.slane %v1582_v19, 2 }
 0x31c   : > { %v3957_v23 = vld [vmem:[#allocation3 + $0x10] sm:$0xff]  ;;  %v1580_v22 = vld [vmem:[#allocation3 + $0x18] sm:$0x3] }
 0x31d   : > { %1711 = vrot.lane.b32.xlu0 %v3957_v23, %s3089_s8  ;;  %v1622_v47 = vsel %vm439_vm0, %v1620_v3, %v1621_v6  ;;  %v1670_v12 = vsel %vm1132_vm12, %v1668_v8, %v1669_v10  ;;  %v1617_v34 = vrot.slane %v3957_v23, 1  ;;  %v1618_v15 = vrot.slane %v1580_v22, 1 }
 0x31e   : > { %v1665_v30 = vrot.slane %v3957_v23, 2  ;;  %v1666_v5 = vrot.slane %v1580_v22, 2 }
 0x31f   : > { %1791 = vrot.lane.b32.xlu1 %v3953_v25, %s3093_s17  ;;  %v1619_v16 = vsel %vm439_vm0, %v1617_v34, %v1618_v15 }
 0x320   : > { %v1667_v31 = vsel %vm1132_vm12, %v1665_v30, %v1666_v5 }
 0x321   : > { %1741 = vrot.lane.b32.xlu0 %v1622_v47, %s3091_s14 }
 0x323   : > { %1642 = vrot.lane.b32.xlu1 %v1622_v47, %s3086_s20 }
 0x325   : > { %1768 = vrot.lane.b32.xlu0 %v1670_v12, %s3095_s15 }
 0x327   : > { %1690 = vrot.lane.b32.xlu1 %v1670_v12, %s3087_s21 }
 0x32b   : > { %1819 = vrot.lane.b32.xlu1 %v1622_v47, %s3094_s18 }
 0x32f   : > { %1846 = vrot.lane.b32.xlu1 %v1670_v12, %s3096_s29 }
 0x330   : > { %v2883_v13 = vpop.f32.mrf.mxu1 }
 0x331   : > { %v1529_v49 = vadd.f32 %v2883_v13, %v3933_v58  ;;  %v1934_v13 = vld [vmem:[%s4622_s4] sm:$0xff] }
 0x332   : > { %v1523_v14 = vpop.f32.mrf.mxu1 }
 0x333   : > { %v3978_v63 = vadd.f32 %v1529_v49, %v1024_v36  ;;  %v1524_v2 = vadd.f32 %v3933_v58, %v1523_v14 }
 0x335   : > { %v1563_v59 = vmax.f32 %v3978_v63, 0.0  ;;  %v3982_v9 = vadd.f32 %v1524_v2, %v1019_v17 }
 0x337   : > { %1572 = vst.msk [vmem:[#allocation3 + $0x41] sm:$0xff] %vm277_vm3, %v1563_v59  ;;  %v1562_v28 = vmax.f32 %v3982_v9, 0.0 }
 0x339   : > { %1571 = vst.msk [vmem:[#allocation3 + $0x31] sm:$0xff] %vm277_vm3, %v1562_v28 }
 0x33e   : > { %v3992_v26 = vld [vmem:[#allocation3 + $0x40] sm:$0xff]  ;;  %v1586_v62 = vld [vmem:[#allocation3 + $0x48] sm:$0x3] }
 0x33f   : > { %1795 = vrot.lane.b32.xlu1 %v3992_v26, %s3093_s17  ;;  %1717 = vrot.lane.b32.xlu0 %v3992_v26, %s3089_s8  ;;  %v1626_v11 = vrot.slane %v3992_v26, 1  ;;  %v1627_v7 = vrot.slane %v1586_v62, 1  ;;  %v1674_v37 = vrot.slane %v3992_v26, 2  ;;  %v1675_v27 = vrot.slane %v1586_v62, 2 }
 0x340   : > { %v4003_v33 = vld [vmem:[#allocation3 + $0x30] sm:$0xff] }
 0x341   : > { %v1628_v57 = vsel %vm439_vm0, %v1626_v11, %v1627_v7  ;;  %v1676_v20 = vsel %vm1132_vm12, %v1674_v37, %v1675_v27  ;;  %v1623_v10 = vrot.slane %v4003_v33, 1  ;;  %v1671_v49 = vrot.slane %v4003_v33, 2 }
 0x343   : > { %1640 = vrot.lane.b32.xlu1 %v1619_v16, %s3086_s20  ;;  %1739 = vrot.lane.b32.xlu0 %v1619_v16, %s3091_s14 }
 0x347   : > { %1688 = vrot.lane.b32.xlu1 %v1667_v31, %s3087_s21  ;;  %1793 = vrot.lane.b32.xlu0 %v4003_v33, %s3093_s17 }
 0x34b   : > { %1766 = vrot.lane.b32.xlu1 %v1667_v31, %s3095_s15  ;;  %1646 = vrot.lane.b32.xlu0 %v1628_v57, %s3086_s20 }
 0x34f   : > { %v2886_v51 = vpop.f32.mrf.mxu1  ;;  %1772 = vrot.lane.b32.xlu0 %v1676_v20, %s3095_s15  ;;  %1715 = vrot.lane.b32.xlu1 %v4003_v33, %s3089_s8 }
 0x350   : > { %v1539_v52 = vadd.f32 %v2886_v51, %v3933_v58 }
 0x351   : > { %v1533_v40 = vpop.f32.mrf.mxu1 }
 0x352   : > { %v4031_v54 = vadd.f32 %v1539_v52, %v3849_v56  ;;  %v1534_v4 = vadd.f32 %v3933_v58, %v1533_v40  ;;  %v1938_v56 = vld [vmem:[%s4622_s4 + $0x20] sm:$0xff]  ;;  %v4124_v52 = vpop.permute.xlu1 %1833 }
 0x353   : > { %1745 = vrot.lane.b32.xlu1 %v1628_v57, %s3091_s14  ;;  %2898 = vmatprep.subr.mxu0 %v1938_v56 }
 0x354   : > { %v1565_v50 = vmax.f32 %v4031_v54, 0.0  ;;  %v4037_v61 = vadd.f32 %v1534_v4, %v3852_v41  ;;  %v2889_v21 = vpop.f32.mrf.mxu1  ;;  %2899 = vmatpush3.msra.mxu0 %v1938_v56 }
 0x355   : > { %v1549_v46 = vadd.f32 %v2889_v21, %v3933_v58  ;;  %2900 = vmatprep.subr.mxu0 %v1937_v38 }
 0x356   : > { %1574 = vst.msk [vmem:[#allocation3 + $0x61] sm:$0xff] %vm277_vm3, %v1565_v50  ;;  %v1564_v39 = vmax.f32 %v4037_v61, 0.0  ;;  %v1543_v41 = vpop.f32.mrf.mxu1  ;;  %2901 = vmatpush3.msra.mxu0 %v1937_v38 }
 0x357   : > { %v4053_v19 = vadd.f32 %v1549_v46, %v3857_v53  ;;  %v1544_v3 = vadd.f32 %v3933_v58, %v1543_v41  ;;  %1694 = vrot.lane.b32.xlu1 %v1676_v20, %s3087_s21  ;;  %v1584_v53 = vld [vmem:[#allocation3 + $0x38] sm:$0x3]  ;;  %2902 = vmatprep.subr.mxu0 %v1936_v35 }
 0x358   : > { %1573 = vst.msk [vmem:[#allocation3 + $0x51] sm:$0xff] %vm277_vm3, %v1564_v39  ;;  %2903 = vmatpush3.msra.mxu0 %v1936_v35  ;;  %v1624_v12 = vrot.slane %v1584_v53, 1  ;;  %v1672_v14 = vrot.slane %v1584_v53, 2  ;;  %v1843_v35 = vrot.slane %v3911_v43, 2  ;;  %v1844_v53 = vrot.slane %v3917_v55, 2 }
 0x359   : > { %v1567_v6 = vmax.f32 %v4053_v19, 0.0  ;;  %v4061_v47 = vadd.f32 %v1544_v3, %v1039_v1  ;;  %2904 = vmatprep.subr.mxu0 %v1935_v32 }
 0x35a   : > { %2905 = vmatpush3.msra.mxu0 %v1935_v32  ;;  %v1625_v36 = vsel %vm439_vm0, %v1623_v10, %v1624_v12  ;;  %v1673_v17 = vsel %vm1132_vm12, %v1671_v49, %v1672_v14  ;;  %v1845_v49 = vsel %vm1132_vm12, %v1843_v35, %v1844_v53 }
 0x35b   : > { %1576 = vst.msk [vmem:[#allocation3 + $0x81] sm:$0xff] %vm277_vm3, %v1567_v6  ;;  %v1566_v58 = vmax.f32 %v4061_v47, 0.0  ;;  %1823 = vrot.lane.b32.xlu1 %v1628_v57, %s3094_s18  ;;  %2906 = vmatprep.subr.mxu0 %v1934_v13 }
 0x35c   : > { %2907 = vmatpush3.msra.mxu0 %v1934_v13 }
 0x35d   : > { %1575 = vst.msk [vmem:[#allocation3 + $0x71] sm:$0xff] %vm277_vm3, %v1566_v58  ;;  %v4077_v8 = vld [vmem:[#allocation3 + $0x60] sm:$0xff]  ;;  %v1590_v2 = vld [vmem:[#allocation3 + $0x68] sm:$0x3] }
 0x35e   : > { %1721 = vrot.lane.b32.xlu0 %v4077_v8, %s3089_s8  ;;  %v1632_v34 = vrot.slane %v4077_v8, 1  ;;  %v1633_v15 = vrot.slane %v1590_v2, 1  ;;  %v1680_v16 = vrot.slane %v4077_v8, 2  ;;  %v1681_v5 = vrot.slane %v1590_v2, 2 }
 0x35f   : > { %1850 = vrot.lane.b32.xlu1 %v1676_v20, %s3096_s29  ;;  %v4097_v22 = vld [vmem:[#allocation3 + $0x50] sm:$0xff]  ;;  %v1588_v31 = vld [vmem:[#allocation3 + $0x58] sm:$0x3] }
 0x360   : > { %v1634_v30 = vsel %vm439_vm0, %v1632_v34, %v1633_v15  ;;  %v1682_v62 = vsel %vm1132_vm12, %v1680_v16, %v1681_v5  ;;  %v1629_v7 = vrot.slane %v4097_v22, 1  ;;  %v1630_v57 = vrot.slane %v1588_v31, 1 }
 0x361   : > { %v1677_v27 = vrot.slane %v4097_v22, 2  ;;  %v1678_v42 = vrot.slane %v1588_v31, 2 }
 0x362   : > { %1644 = vrot.lane.b32.xlu0 %v1625_v36, %s3086_s20  ;;  %v1593_v11 = vld [vmem:[#allocation3 + $0x80] sm:$0xff]  ;;  %v1631_v37 = vsel %vm439_vm0, %v1629_v7, %v1630_v57  ;;  %v1594_v51 = vld [vmem:[#allocation3 + $0x88] sm:$0x3] }
 0x363   : > { %1799 = vrot.lane.b32.xlu1 %v4077_v8, %s3093_s17  ;;  %v1679_v20 = vsel %vm1132_vm12, %v1677_v27, %v1678_v42  ;;  %v1763_v44 = vrot.slane %v1593_v11, 2  ;;  %v1764_v45 = vrot.slane %v1594_v51, 2  ;;  %v1736_v32 = vrot.slane %v1593_v11, 1 }
 0x364   : > { %v4127_v40 = vld [vmem:[#allocation3 + $0x70] sm:$0xff]  ;;  %v1592_v4 = vld [vmem:[#allocation3 + $0x78] sm:$0x3]  ;;  %v1737_v12 = vrot.slane %v1594_v51, 1 }
 0x365   : > { %v1765_v21 = vsel %vm1132_vm12, %v1763_v44, %v1764_v45  ;;  %v1635_v46 = vrot.slane %v4127_v40, 1  ;;  %v1636_v56 = vrot.slane %v1592_v4, 1  ;;  %v1683_v1 = vrot.slane %v4127_v40, 2 }
 0x366   : > { %1692 = vrot.lane.b32.xlu0 %v1673_v17, %s3087_s21  ;;  %v1684_v3 = vrot.slane %v1592_v4, 2  ;;  %v1738_v14 = vsel %vm439_vm0, %v1736_v32, %v1737_v12 }
 0x367   : > { %1743 = vrot.lane.b32.xlu1 %v1625_v36, %s3091_s14  ;;  %v1637_v41 = vsel %vm439_vm0, %v1635_v46, %v1636_v56 }
 0x368   : > { %v1685_v13 = vsel %vm1132_vm12, %v1683_v1, %v1684_v3 }
 0x36a   : > { %1821 = vrot.lane.b32.xlu0 %v1625_v36, %s3094_s18  ;;  %v1639_v36 = vpop.permute.xlu0 %1638 }
 0x36b   : > { %1848 = vrot.lane.b32.xlu1 %v1673_v17, %s3096_s29 }
 0x36e   : > { %1770 = vrot.lane.b32.xlu0 %v1673_v17, %s3095_s15  ;;  %v1687_v55 = vpop.permute.xlu0 %1686 }
 0x36f   : > { %1719 = vrot.lane.b32.xlu1 %v4097_v22, %s3089_s8 }
 0x372   : > { %1797 = vrot.lane.b32.xlu0 %v4097_v22, %s3093_s17 }
 0x373   : > { %1749 = vrot.lane.b32.xlu1 %v1634_v30, %s3091_s14 }
 0x376   : > { %1650 = vrot.lane.b32.xlu0 %v1634_v30, %s3086_s20 }
 0x377   : > { %1698 = vrot.lane.b32.xlu1 %v1682_v62, %s3087_s21 }
 0x37a   : > { %1776 = vrot.lane.b32.xlu0 %v1682_v62, %s3095_s15 }
 0x37b   : > { %1827 = vrot.lane.b32.xlu1 %v1634_v30, %s3094_s18 }
 0x37e   : > { %1725 = vrot.lane.b32.xlu0 %v1593_v11, %s3089_s8 }
 0x37f   : > { %1854 = vrot.lane.b32.xlu1 %v1682_v62, %s3096_s29 }
 0x382   : > { %1803 = vrot.lane.b32.xlu0 %v1593_v11, %s3093_s17  ;;  %v1870_v11 = vsel %vm277_vm3, %v3907_v29, %v1639_v36 }
 0x383   : > { %1747 = vrot.lane.b32.xlu1 %v1631_v37, %s3091_s14  ;;  %v1878_v7 = vsel %vm712_vm6, %v1870_v11, %v1687_v55 }
 0x386   : > { %1648 = vrot.lane.b32.xlu0 %v1631_v37, %s3086_s20 }
 0x387   : > { %1852 = vrot.lane.b32.xlu1 %v1679_v20, %s3096_s29 }
 0x38a   : > { %1696 = vrot.lane.b32.xlu0 %v1679_v20, %s3087_s21 }
 0x38b   : > { %1723 = vrot.lane.b32.xlu1 %v4127_v40, %s3089_s8 }
 0x38d   : > { %v1714_v38 = vpop.permute.xlu1 %1713 }
 0x38e   : > { %1825 = vrot.lane.b32.xlu0 %v1631_v37, %s3094_s18 }
 0x38f   : > { %1780 = vrot.lane.b32.xlu1 %v1765_v21, %s3095_s15  ;;  %v1712_v2 = vpop.permute.xlu0 %1711 }
 0x390   : > { %v1886_v27 = vsel %vm730_vm8, %v1878_v7, %v1712_v2 }
 0x391   : > { %v1792_v10 = vpop.permute.xlu1 %1791 }
 0x392   : > { %1774 = vrot.lane.b32.xlu0 %v1679_v20, %s3095_s15 }
 0x393   : > { %1751 = vrot.lane.b32.xlu1 %v1637_v41, %s3091_s14  ;;  %v1742_v15 = vpop.permute.xlu0 %1741 }
 0x395   : > { %v1643_v43 = vpop.permute.xlu1 %1642 }
 0x396   : > { %1801 = vrot.lane.b32.xlu0 %v4127_v40, %s3093_s17 }
 0x397   : > { %1778 = vrot.lane.b32.xlu1 %v1685_v13, %s3095_s15  ;;  %v1769_v16 = vpop.permute.xlu0 %1768 }
 0x399   : > { %v1691_v17 = vpop.permute.xlu1 %1690 }
 0x39a   : > { %1753 = vrot.lane.b32.xlu0 %v1738_v14, %s3091_s14 }
 0x39b   : > { %1860 = vrot.lane.b32.xlu1 %v1845_v49, %s3096_s29 }
 0x39d   : > { %v1820_v34 = vpop.permute.xlu1 %1819 }
 0x39e   : > { %1831 = vrot.lane.b32.xlu0 %v1738_v14, %s3094_s18 }
 0x3a1   : > { %v1847_v30 = vpop.permute.xlu1 %1846 }
 0x3a2   : > { %1652 = vrot.lane.b32.xlu0 %v1637_v41, %s3086_s20 }
 0x3a6   : > { %1700 = vrot.lane.b32.xlu0 %v1685_v13, %s3087_s21 }
 0x3aa   : > { %1829 = vrot.lane.b32.xlu0 %v1637_v41, %s3094_s18 }
 0x3ae   : > { %1856 = vrot.lane.b32.xlu0 %v1685_v13, %s3096_s29 }
 0x3b1   : > { %v1796_v5 = vpop.permute.xlu1 %1795  ;;  %v1718_v62 = vpop.permute.xlu0 %1717 }
 0x3b2   : > { %1858 = vrot.lane.b32.xlu0 %v1765_v21, %s3096_s29 }
 0x3b5   : > { %v1641_v31 = vpop.permute.xlu1 %1640  ;;  %v1740_v37 = vpop.permute.xlu0 %1739 }
 0x3b6   : > { %v1894_v42 = vsel %vm748_vm10, %v1886_v27, %v1740_v37  ;;  %v1871_v35 = vsel %vm277_vm3, %v3957_v23, %v1641_v31  ;;  %v1872_v23 = vsel %vm277_vm3, %v3953_v25, %v1643_v43 }
 0x3b7   : > { %v1880_v7 = vsel %vm712_vm6, %v1872_v23, %v1691_v17 }
 0x3b9   : > { %v1689_v57 = vpop.permute.xlu1 %1688  ;;  %v1794_v45 = vpop.permute.xlu0 %1793 }
 0x3ba   : > { %v1879_v53 = vsel %vm712_vm6, %v1871_v35, %v1689_v57 }
 0x3bb   : > { %v1887_v12 = vsel %vm730_vm8, %v1879_v53, %v1714_v38 }
 0x3bc   : > { %v1895_v49 = vsel %vm748_vm10, %v1887_v12, %v1742_v15 }
 0x3bd   : > { %v1767_v20 = vpop.permute.xlu1 %1766  ;;  %v1647_v56 = vpop.permute.xlu0 %1646  ;;  %v1903_v2 = vsel %vm1373_vm13, %v1895_v49, %v1769_v16 }
 0x3be   : > { %v1902_v51 = vsel %vm1373_vm13, %v1894_v42, %v1767_v20  ;;  %v1874_v23 = vsel %vm277_vm3, %v3992_v26, %v1647_v56 }
 0x3bf   : > { %v1910_v44 = vsel %vm1382_vm14, %v1902_v51, %v1792_v10 }
 0x3c0   : > { %v1918_v4 = vsel %vm1391_vm15, %v1910_v44, %v1820_v34 }
 0x3c1   : > { %v1716_v21 = vpop.permute.xlu1 %1715  ;;  %v1926_v46 = vsel %vm1400_vm1, %v1918_v4, %v1847_v30  ;;  %v1773_v1 = vpop.permute.xlu0 %1772  ;;  %v1911_v30 = vsel %vm1382_vm14, %v1903_v2, %v1794_v45 }
 0x3c2   : > { %2908 = vmatprep.mubr.msk.f32.mxu0 %vm1422_vm2, %v1926_v46  ;;  %v1888_v57 = vsel %vm730_vm8, %v1880_v7, %v1716_v21 }
 0x3c5   : > { %v1746_v29 = vpop.permute.xlu1 %1745 }
 0x3c9   : > { %v1695_v41 = vpop.permute.xlu1 %1694 }
 0x3cd   : > { %v1824_v3 = vpop.permute.xlu1 %1823 }
 0x3d0   : > { %v4168_v32 = vpop.permute.xlu0 %1721 }
 0x3d1   : > { %v1851_v10 = vpop.permute.xlu1 %1850 }
 0x3d4   : > { %v1645_v13 = vpop.permute.xlu0 %1644 }
 0x3d5   : > { %v1800_v36 = vpop.permute.xlu1 %1799  ;;  %v1873_v35 = vsel %vm277_vm3, %v4003_v33, %v1645_v13  ;;  %v1882_v13 = vsel %vm712_vm6, %v1874_v23, %v1695_v41 }
 0x3d8   : > { %v1693_v14 = vpop.permute.xlu0 %1692 }
 0x3d9   : > { %v1744_v55 = vpop.permute.xlu1 %1743 }
 0x3da   : > { %v1896_v15 = vsel %vm748_vm10, %v1888_v57, %v1744_v55 }
 0x3dc   : > { %v1822_v34 = vpop.permute.xlu0 %1821 }
 0x3dd   : > { %v1919_v31 = vsel %vm1391_vm15, %v1911_v30, %v1822_v34  ;;  %v1849_v11 = vpop.permute.xlu1 %1848 }
 0x3de   : > { %v1927_v38 = vsel %vm1400_vm1, %v1919_v31, %v1849_v11 }
 0x3df   : > { %2909 = vmatmul.mubr.msk.f32.vlgmr.msra.gmra.mxu0 %vm1422_vm2, %v1927_v38 }
 0x3e0   : > { %v1771_v16 = vpop.permute.xlu0 %1770 }
 0x3e1   : > { %v1904_v37 = vsel %vm1373_vm13, %v1896_v15, %v1771_v16  ;;  %v1720_v27 = vpop.permute.xlu1 %1719 }
 0x3e2   : > { %v1912_v42 = vsel %vm1382_vm14, %v1904_v37, %v1796_v5  ;;  %v1881_v5 = vsel %vm712_vm6, %v1873_v35, %v1693_v14 }
 0x3e3   : > { %v1920_v25 = vsel %vm1391_vm15, %v1912_v42, %v1824_v3  ;;  %v1889_v12 = vsel %vm730_vm8, %v1881_v5, %v1718_v62  ;;  %v1890_v62 = vsel %vm730_vm8, %v1882_v13, %v1720_v27 }
 0x3e4   : > { %v1798_v43 = vpop.permute.xlu0 %1797  ;;  %v1928_v20 = vsel %vm1400_vm1, %v1920_v25, %v1851_v10  ;;  %v1897_v49 = vsel %vm748_vm10, %v1889_v12, %v1746_v29 }
 0x3e5   : > { %2911 = vmatprep.mubr.msk.f32.mxu0 %vm1422_vm2, %v1928_v20  ;;  %v1750_v17 = vpop.permute.xlu1 %1749  ;;  %v1905_v2 = vsel %vm1373_vm13, %v1897_v49, %v1773_v1  ;;  %v4224_v49 = vld [vmem:[#allocation4] sm:$0xff] }
 0x3e6   : > { %v1913_v34 = vsel %vm1382_vm14, %v1905_v2, %v1798_v43 }
 0x3e8   : > { %v1651_v51 = vpop.permute.xlu0 %1650 }
 0x3e9   : > { %v1699_v44 = vpop.permute.xlu1 %1698  ;;  %v1876_v35 = vsel %vm277_vm3, %v4077_v8, %v1651_v51  ;;  %v2178_v8 = vrot.slane %v4224_v49, 2 }
 0x3ea   : > { %v1884_v12 = vsel %vm712_vm6, %v1876_v35, %v1699_v44 }
 0x3ec   : > { %v1777_v45 = vpop.permute.xlu0 %1776 }
 0x3ed   : > { %v1828_v4 = vpop.permute.xlu1 %1827 }
 0x3f0   : > { %v1726_v21 = vpop.permute.xlu0 %1725 }
 0x3f1   : > { %v1855_v53 = vpop.permute.xlu1 %1854 }
 0x3f4   : > { %v4187_v46 = vpop.permute.xlu0 %1803 }
 0x3f5   : > { %v1748_v10 = vpop.permute.xlu1 %1747 }
 0x3f6   : > { %v1898_v29 = vsel %vm748_vm10, %v1890_v62, %v1748_v10 }
 0x3f8   : > { %v1649_v3 = vpop.permute.xlu0 %1648 }
 0x3f9   : > { %v1853_v31 = vpop.permute.xlu1 %1852  ;;  %v1875_v37 = vsel %vm277_vm3, %v4097_v22, %v1649_v3 }
 0x3fc   : > { %v1697_v55 = vpop.permute.xlu0 %1696 }
 0x3fd   : > { %v1724_v41 = vpop.permute.xlu1 %1723  ;;  %v1883_v42 = vsel %vm712_vm6, %v1875_v37, %v1697_v55 }
 0x3fe   : > { %v1892_v55 = vsel %vm730_vm8, %v1884_v12, %v1724_v41 }
 0x400   : > { %v1826_v30 = vpop.permute.xlu0 %1825 }
 0x401   : > { %v1921_v33 = vsel %vm1391_vm15, %v1913_v34, %v1826_v30  ;;  %v1781_v16 = vpop.permute.xlu1 %1780 }
 0x402   : > { %v1929_v14 = vsel %vm1400_vm1, %v1921_v33, %v1853_v31 }
 0x403   : > { %2912 = vmatmul.mubr.msk.f32.gmra.mxu0 %vm1422_vm2, %v1929_v14 }
 0x404   : > { %v1775_v1 = vpop.permute.xlu0 %1774 }
 0x405   : > { %v1906_v11 = vsel %vm1373_vm13, %v1898_v29, %v1775_v1  ;;  %v1752_v25 = vpop.permute.xlu1 %1751 }
 0x406   : > { %v1914_v7 = vsel %vm1382_vm14, %v1906_v11, %v1800_v36  ;;  %v1891_v36 = vsel %vm730_vm8, %v1883_v42, %v4168_v32  ;;  %v4249_v11 = vld [vmem:[#allocation4 + $0x98] sm:$0x3] }
 0x407   : > { %v1922_v26 = vsel %vm1391_vm15, %v1914_v7, %v1828_v4  ;;  %v1899_v22 = vsel %vm748_vm10, %v1891_v36, %v1750_v17  ;;  %v1900_v17 = vsel %vm748_vm10, %v1892_v55, %v1752_v25 }
 0x408   : > { %v1802_v56 = vpop.permute.xlu0 %1801  ;;  %v1930_v38 = vsel %vm1400_vm1, %v1922_v26, %v1855_v53  ;;  %v1907_v2 = vsel %vm1373_vm13, %v1899_v22, %v1777_v45  ;;  %v2130_v26 = vrot.slane %v4224_v49, 1 }
 0x409   : > { %2914 = vmatprep.mubr.msk.f32.mxu0 %vm1422_vm2, %v1930_v38  ;;  %v1779_v10 = vpop.permute.xlu1 %1778 }
 0x40a   : > { %v1908_v34 = vsel %vm1373_vm13, %v1900_v17, %v1779_v10 }
 0x40b   : > { %v1916_v45 = vsel %vm1382_vm14, %v1908_v34, %v4187_v46 }
 0x40c   : > { %v1754_v57 = vpop.permute.xlu0 %1753 }
 0x40d   : > { %v1861_v14 = vpop.permute.xlu1 %1860 }
 0x410   : > { %v1832_v15 = vpop.permute.xlu0 %1831 }
 0x411   : > { %v1924_v62 = vsel %vm1391_vm15, %v1916_v45, %v1832_v15 }
 0x414   : > { %v1653_v27 = vpop.permute.xlu0 %1652 }
 0x415   : > { %v1877_v43 = vsel %vm277_vm3, %v4127_v40, %v1653_v27  ;;  %v2094_v40 = vld [vmem:[#allocation4 + $0x8] sm:$0x3] }
 0x416   : > { %v2179_v51 = vrot.slane %v2094_v40, 2 }
 0x418   : > { %v1701_v20 = vpop.permute.xlu0 %1700  ;;  %v2180_v31 = vsel %vm1132_vm12, %v2178_v8, %v2179_v51 }
 0x419   : > { %v1885_v4 = vsel %vm712_vm6, %v1877_v43, %v1701_v20  ;;  %2202 = vrot.lane.b32.xlu1 %v2180_v31, %s3087_s21 }
 0x41a   : > { %v1893_v53 = vsel %vm730_vm8, %v1885_v4, %v1726_v21  ;;  %v1915_v21 = vsel %vm1382_vm14, %v1907_v2, %v1802_v56  ;;  %v2131_v56 = vrot.slane %v2094_v40, 1 }
 0x41b   : > { %v1901_v5 = vsel %vm748_vm10, %v1893_v53, %v1754_v57  ;;  %v4264_v57 = vld [vmem:[%s4624_s6 + $0x3] ss:$0 sm:$0xff] }
 0x41c   : > { %v1830_v3 = vpop.permute.xlu0 %1829  ;;  %v1909_v32 = vsel %vm1373_vm13, %v1901_v5, %v1781_v16  ;;  %v2132_v41 = vsel %vm439_vm0, %v2130_v26, %v2131_v56 }
 0x41d   : > { %v1923_v44 = vsel %vm1391_vm15, %v1915_v21, %v1830_v3  ;;  %v1917_v30 = vsel %vm1382_vm14, %v1909_v32, %v4119_v24  ;;  %v4244_v24 = vld [vmem:[#allocation4 + $0x90] sm:$0xff]  ;;  %2154 = vrot.lane.b32.xlu0 %v2132_v41, %s3086_s20 }
 0x41e   : > { %v1925_v13 = vsel %vm1391_vm15, %v1917_v30, %v4124_v52  ;;  %2321 = vrot.lane.b32.xlu1 %v4244_v24, %s3093_s17  ;;  %v2332_v46 = vrot.slane %v4244_v24, 1  ;;  %v2333_v52 = vrot.slane %v4249_v11, 1 }
 0x41f   : > { %v1933_v7 = vsel %vm1400_vm1, %v1925_v13, %v1861_v14 }
 0x420   : > { %v1857_v23 = vpop.permute.xlu0 %1856  ;;  %v2334_v38 = vsel %vm439_vm0, %v2332_v46, %v2333_v52 }
 0x421   : > { %v1931_v33 = vsel %vm1400_vm1, %v1923_v44, %v1857_v23 }
 0x422   : > { %2915 = vmatmul.mubr.msk.f32.gmra.mxu0 %vm1422_vm2, %v1931_v33  ;;  %2349 = vrot.lane.b32.xlu1 %v2334_v38, %s3094_s18 }
 0x424   : > { %v1859_v29 = vpop.permute.xlu0 %1858 }
 0x425   : > { %v1932_v1 = vsel %vm1400_vm1, %v1924_v62, %v1859_v29 }
 0x426   : > { %2917 = vmatprep.mubr.msk.f32.mxu0 %vm1422_vm2, %v1932_v1 }
 0x427   : > { %2918 = vmatmul.mubr.msk.f32.gmra.mxu0 %vm1422_vm2, %v1933_v7 }
 0x49f   : > { %v2910_v15 = vpop.f32.mrf.mxu0 }
 0x4a0   : > { %v2043_v16 = vadd.f32 %v2910_v15, %v4264_v57 }
 0x4a1   : > { %v2037_v37 = vpop.f32.mrf.mxu0 }
 0x4a2   : > { %v2077_v27 = vmax.f32 %v2043_v16, 0.0  ;;  %v2038_v42 = vadd.f32 %v4264_v57, %v2037_v37 }
 0x4a4   : > { %2086 = vst.msk [vmem:[#allocation4 + $0x21] sm:$0xff] %vm277_vm3, %v2077_v27  ;;  %v2076_v25 = vmax.f32 %v2038_v42, 0.0 }
 0x4a6   : > { %2085 = vst.msk [vmem:[#allocation4 + $0x11] sm:$0xff] %vm277_vm3, %v2076_v25 }
 0x4ab   : > { %v4270_v36 = vld [vmem:[#allocation4 + $0x20] sm:$0xff]  ;;  %v2098_v43 = vld [vmem:[#allocation4 + $0x28] sm:$0x3] }
 0x4ac   : > { %2307 = vrot.lane.b32.xlu0 %v4270_v36, %s3093_s17  ;;  %2229 = vrot.lane.b32.xlu1 %v4270_v36, %s3089_s8  ;;  %v2136_v20 = vrot.slane %v4270_v36, 1  ;;  %v2137_v4 = vrot.slane %v2098_v43, 1  ;;  %v2184_v22 = vrot.slane %v4270_v36, 2  ;;  %v2185_v5 = vrot.slane %v2098_v43, 2 }
 0x4ad   : > { %v4278_v53 = vld [vmem:[#allocation4 + $0x10] sm:$0xff]  ;;  %v2096_v51 = vld [vmem:[#allocation4 + $0x18] sm:$0x3] }
 0x4ae   : > { %v2138_v35 = vsel %vm439_vm0, %v2136_v20, %v2137_v4  ;;  %v2186_v3 = vsel %vm1132_vm12, %v2184_v22, %v2185_v5  ;;  %v2133_v34 = vrot.slane %v4278_v53, 1  ;;  %v2134_v44 = vrot.slane %v2096_v51, 1 }
 0x4af   : > { %v2181_v31 = vrot.slane %v4278_v53, 2  ;;  %v2182_v45 = vrot.slane %v2096_v51, 2  ;;  %v2458_v51 = vld [vmem:[%s4623_s5 + $0x40] sm:$0xff] }
 0x4b0   : > { %2158 = vrot.lane.b32.xlu0 %v2138_v35, %s3086_s20  ;;  %2227 = vrot.lane.b32.xlu1 %v4278_v53, %s3089_s8  ;;  %v2135_v33 = vsel %vm439_vm0, %v2133_v34, %v2134_v44  ;;  %v2457_v34 = vld [vmem:[%s4623_s5 + $0x38] sm:$0xff]  ;;  %v2456_v44 = vld [vmem:[%s4623_s5 + $0x30] sm:$0xff] }
 0x4b1   : > { %v2183_v29 = vsel %vm1132_vm12, %v2181_v31, %v2182_v45  ;;  %2950 = vmatprep.subr.mxu1 %v2458_v51  ;;  %2920 = vmatprep.subr.mxu0 %v2458_v51  ;;  %v2454_v31 = vld [vmem:[%s4623_s5 + $0x20] sm:$0xff] }
 0x4b2   : > { %2959 = vmatpush3.msra.mxu1 %v2458_v51  ;;  %2921 = vmatpush3.msra.mxu0 %v2458_v51  ;;  %v2360_v51 = vrot.slane %v4249_v11, 2 }
 0x4b3   : > { %2951 = vmatprep.subr.mxu1 %v2457_v34  ;;  %2922 = vmatprep.subr.mxu0 %v2457_v34 }
 0x4b4   : > { %2206 = vrot.lane.b32.xlu0 %v2186_v3, %s3087_s21  ;;  %2257 = vrot.lane.b32.xlu1 %v2138_v35, %s3091_s14 }
 0x4b5   : > { %2960 = vmatpush3.msra.mxu1 %v2457_v34  ;;  %2923 = vmatpush3.msra.mxu0 %v2457_v34 }
 0x4b6   : > { %2952 = vmatprep.subr.mxu1 %v2456_v44  ;;  %2924 = vmatprep.subr.mxu0 %v2456_v44 }
 0x4b7   : > { %2961 = vmatpush3.msra.mxu1 %v2456_v44  ;;  %2925 = vmatpush3.msra.mxu0 %v2456_v44 }
 0x4b8   : > { %2284 = vrot.lane.b32.xlu0 %v2186_v3, %s3095_s15 }
 0x4bc   : > { %2335 = vrot.lane.b32.xlu0 %v2138_v35, %s3094_s18 }
 0x4c0   : > { %2362 = vrot.lane.b32.xlu0 %v2186_v3, %s3096_s29 }
 0x4c3   : > { %v2913_v12 = vpop.f32.mrf.mxu0 }
 0x4c4   : > { %v2053_v10 = vadd.f32 %v2913_v12, %v4264_v57 }
 0x4c5   : > { %v2047_v32 = vpop.f32.mrf.mxu0 }
 0x4c6   : > { %v2079_v40 = vmax.f32 %v2053_v10, 0.0  ;;  %v2048_v55 = vadd.f32 %v4264_v57, %v2047_v32 }
 0x4c8   : > { %2088 = vst.msk [vmem:[#allocation4 + $0x41] sm:$0xff] %vm277_vm3, %v2079_v40  ;;  %v2078_v2 = vmax.f32 %v2048_v55, 0.0 }
 0x4ca   : > { %2087 = vst.msk [vmem:[#allocation4 + $0x31] sm:$0xff] %vm277_vm3, %v2078_v2 }
 0x4cf   : > { %v4294_v8 = vld [vmem:[#allocation4 + $0x40] sm:$0xff]  ;;  %v2102_v21 = vld [vmem:[#allocation4 + $0x48] sm:$0x3] }
 0x4d0   : > { %2233 = vrot.lane.b32.xlu1 %v4294_v8, %s3089_s8  ;;  %v2142_v30 = vrot.slane %v4294_v8, 1  ;;  %v2143_v23 = vrot.slane %v2102_v21, 1  ;;  %v2190_v14 = vrot.slane %v4294_v8, 2  ;;  %v2191_v62 = vrot.slane %v2102_v21, 2 }
 0x4d1   : > { %v4298_v17 = vld [vmem:[#allocation4 + $0x30] sm:$0xff]  ;;  %v2100_v43 = vld [vmem:[#allocation4 + $0x38] sm:$0x3] }
 0x4d2   : > { %2231 = vrot.lane.b32.xlu0 %v4298_v17, %s3089_s8  ;;  %v2144_v13 = vsel %vm439_vm0, %v2142_v30, %v2143_v23  ;;  %v2192_v1 = vsel %vm1132_vm12, %v2190_v14, %v2191_v62  ;;  %v2139_v20 = vrot.slane %v4298_v17, 1  ;;  %v2140_v4 = vrot.slane %v2100_v43, 1  ;;  %v2455_v30 = vld [vmem:[%s4623_s5 + $0x28] sm:$0xff]  ;;  %v2453_v14 = vld [vmem:[%s4623_s5 + $0x18] sm:$0xff]  ;;  %v2452_v62 = vld [vmem:[%s4623_s5 + $0x10] sm:$0xff] }
 0x4d3   : > { %v2187_v35 = vrot.slane %v4298_v17, 2  ;;  %v2188_v22 = vrot.slane %v2100_v43, 2  ;;  %2953 = vmatprep.subr.mxu1 %v2455_v30  ;;  %2926 = vmatprep.subr.mxu0 %v2455_v30  ;;  %v2155_v43 = vpop.permute.xlu0 %2154 }
 0x4d4   : > { %2311 = vrot.lane.b32.xlu1 %v4294_v8, %s3093_s17  ;;  %2962 = vmatpush3.msra.mxu1 %v2455_v30 }
 0x4d5   : > { %v4345_v5 = vsel %vm1132_vm12, %v2187_v35, %v2188_v22  ;;  %2954 = vmatprep.subr.mxu1 %v2454_v31  ;;  %2927 = vmatpush3.msra.mxu0 %v2455_v30 }
 0x4d6   : > { %2309 = vrot.lane.b32.xlu0 %v4298_v17, %s3093_s17  ;;  %2963 = vmatpush3.msra.mxu1 %v2454_v31 }
 0x4d7   : > { %2955 = vmatprep.subr.mxu1 %v2453_v14  ;;  %2928 = vmatprep.subr.mxu0 %v2454_v31 }
 0x4d8   : > { %2156 = vrot.lane.b32.xlu1 %v2135_v33, %s3086_s20  ;;  %2964 = vmatpush3.msra.mxu1 %v2453_v14 }
 0x4d9   : > { %2956 = vmatprep.subr.mxu1 %v2452_v62  ;;  %2929 = vmatpush3.msra.mxu0 %v2454_v31 }
 0x4da   : > { %2261 = vrot.lane.b32.xlu0 %v2144_v13, %s3091_s14  ;;  %2965 = vmatpush3.msra.mxu1 %v2452_v62 }
 0x4db   : > { %2930 = vmatprep.subr.mxu0 %v2453_v14 }
 0x4dc   : > { %2204 = vrot.lane.b32.xlu1 %v2183_v29, %s3087_s21  ;;  %2931 = vmatpush3.msra.mxu0 %v2453_v14 }
 0x4dd   : > { %2932 = vmatprep.subr.mxu0 %v2452_v62 }
 0x4de   : > { %2288 = vrot.lane.b32.xlu0 %v2192_v1, %s3095_s15  ;;  %2933 = vmatpush3.msra.mxu0 %v2452_v62 }
 0x4e0   : > { %2255 = vrot.lane.b32.xlu1 %v2135_v33, %s3091_s14 }
 0x4e2   : > { %v2916_v7 = vpop.f32.mrf.mxu0 }
 0x4e3   : > { %v2063_v46 = vadd.f32 %v2916_v7, %v4264_v57 }
 0x4e4   : > { %2282 = vrot.lane.b32.xlu1 %v2183_v29, %s3095_s15  ;;  %v2057_v52 = vpop.f32.mrf.mxu0  ;;  %v2451_v29 = vld [vmem:[%s4623_s5 + $0x8] sm:$0xff] }
 0x4e5   : > { %v2081_v26 = vmax.f32 %v2063_v46, 0.0  ;;  %v2058_v56 = vadd.f32 %v4264_v57, %v2057_v52  ;;  %v2450_v52 = vld [vmem:[%s4623_s5] sm:$0xff]  ;;  %2957 = vmatprep.subr.mxu1 %v2451_v29  ;;  %2934 = vmatprep.subr.mxu0 %v2451_v29 }
 0x4e6   : > { %2966 = vmatpush3.msra.mxu1 %v2451_v29  ;;  %2935 = vmatpush3.msra.mxu0 %v2451_v29 }
 0x4e7   : > { %2090 = vst.msk [vmem:[#allocation4 + $0x61] sm:$0xff] %vm277_vm3, %v2081_v26  ;;  %v2080_v38 = vmax.f32 %v2058_v56, 0.0  ;;  %v2919_v41 = vpop.f32.mrf.mxu0  ;;  %2958 = vmatprep.subr.mxu1 %v2450_v52  ;;  %2936 = vmatprep.subr.mxu0 %v2450_v52 }
 0x4e8   : > { %v2073_v15 = vadd.f32 %v2919_v41, %v4264_v57  ;;  %2162 = vrot.lane.b32.xlu1 %v2144_v13, %s3086_s20  ;;  %2967 = vmatpush3.msra.mxu1 %v2450_v52 }
 0x4e9   : > { %2089 = vst.msk [vmem:[#allocation4 + $0x51] sm:$0xff] %vm277_vm3, %v2080_v38  ;;  %v2067_v16 = vpop.f32.mrf.mxu0  ;;  %2937 = vmatpush3.msra.mxu0 %v2450_v52 }
 0x4ea   : > { %v2083_v37 = vmax.f32 %v2073_v15, 0.0  ;;  %v2068_v27 = vadd.f32 %v4264_v57, %v2067_v16  ;;  %v2141_v57 = vsel %vm439_vm0, %v2139_v20, %v2140_v4 }
 0x4ec   : > { %2092 = vst.msk [vmem:[#allocation4 + $0x81] sm:$0xff] %vm277_vm3, %v2083_v37  ;;  %v2082_v42 = vmax.f32 %v2068_v27, 0.0  ;;  %2210 = vrot.lane.b32.xlu1 %v2192_v1, %s3087_s21 }
 0x4ee   : > { %2091 = vst.msk [vmem:[#allocation4 + $0x71] sm:$0xff] %vm277_vm3, %v2082_v42  ;;  %v4330_v25 = vld [vmem:[#allocation4 + $0x60] sm:$0xff]  ;;  %v2106_v3 = vld [vmem:[#allocation4 + $0x68] sm:$0x3]  ;;  %v2203_v42 = vpop.permute.xlu1 %2202 }
 0x4ef   : > { %2237 = vrot.lane.b32.xlu0 %v4330_v25, %s3089_s8  ;;  %v2148_v10 = vrot.slane %v4330_v25, 1  ;;  %v2149_v32 = vrot.slane %v2106_v3, 1  ;;  %v2196_v55 = vrot.slane %v4330_v25, 2  ;;  %v2197_v2 = vrot.slane %v2106_v3, 2 }
 0x4f0   : > { %2339 = vrot.lane.b32.xlu1 %v2144_v13, %s3094_s18  ;;  %v4349_v12 = vld [vmem:[#allocation4 + $0x50] sm:$0xff]  ;;  %v2104_v23 = vld [vmem:[#allocation4 + $0x58] sm:$0x3] }
 0x4f1   : > { %v2150_v40 = vsel %vm439_vm0, %v2148_v10, %v2149_v32  ;;  %v2198_v21 = vsel %vm1132_vm12, %v2196_v55, %v2197_v2  ;;  %v2145_v45 = vrot.slane %v4349_v12, 1  ;;  %v2146_v13 = vrot.slane %v2104_v23, 1 }
 0x4f2   : > { %v2193_v7 = vrot.slane %v4349_v12, 2  ;;  %v2194_v46 = vrot.slane %v2104_v23, 2  ;;  %v2359_v2 = vrot.slane %v4244_v24, 2 }
 0x4f3   : > { %2315 = vrot.lane.b32.xlu0 %v4330_v25, %s3093_s17  ;;  %v2109_v33 = vld [vmem:[#allocation4 + $0x80] sm:$0xff]  ;;  %v2110_v56 = vld [vmem:[#allocation4 + $0x88] sm:$0x3] }
 0x4f4   : > { %2366 = vrot.lane.b32.xlu1 %v2192_v1, %s3096_s29  ;;  %v2147_v1 = vsel %vm439_vm0, %v2145_v45, %v2146_v13  ;;  %v2195_v26 = vsel %vm1132_vm12, %v2193_v7, %v2194_v46  ;;  %v2279_v38 = vrot.slane %v2109_v33, 2  ;;  %v2280_v15 = vrot.slane %v2110_v56, 2 }
 0x4f5   : > { %v4404_v41 = vld [vmem:[#allocation4 + $0x70] sm:$0xff]  ;;  %v2252_v16 = vrot.slane %v2109_v33, 1  ;;  %v2253_v27 = vrot.slane %v2110_v56, 1  ;;  %v2108_v4 = vld [vmem:[#allocation4 + $0x78] sm:$0x3]  ;;  %v2361_v44 = vsel %vm1132_vm12, %v2359_v2, %v2360_v51  ;;  %v2386_v46 = vsel %vm277_vm3, %v4224_v49, %v2155_v43 }
 0x4f6   : > { %v2281_v37 = vsel %vm1132_vm12, %v2279_v38, %v2280_v15  ;;  %v2151_v35 = vrot.slane %v4404_v41, 1  ;;  %v2152_v22 = vrot.slane %v2108_v4, 1  ;;  %v2199_v32 = vrot.slane %v4404_v41, 2 }
 0x4f7   : > { %2259 = vrot.lane.b32.xlu0 %v2141_v57, %s3091_s14  ;;  %v2254_v20 = vsel %vm439_vm0, %v2252_v16, %v2253_v27  ;;  %v2394_v38 = vsel %vm712_vm6, %v2386_v46, %v2203_v42 }
 0x4f8   : > { %2160 = vrot.lane.b32.xlu1 %v2141_v57, %s3086_s20  ;;  %v2153_v10 = vsel %vm439_vm0, %v2151_v35, %v2152_v22 }
 0x4fb   : > { %2337 = vrot.lane.b32.xlu0 %v2141_v57, %s3094_s18  ;;  %v4414_v57 = vpop.permute.xlu1 %2321 }
 0x4fc   : > { %2208 = vrot.lane.b32.xlu1 %v4345_v5, %s3087_s21 }
 0x4ff   : > { %2313 = vrot.lane.b32.xlu0 %v4349_v12, %s3093_s17  ;;  %v4423_v55 = vpop.permute.xlu1 %2349 }
 0x500   : > { %2286 = vrot.lane.b32.xlu1 %v4345_v5, %s3095_s15 }
 0x503   : > { %2265 = vrot.lane.b32.xlu0 %v2150_v40, %s3091_s14 }
 0x504   : > { %2235 = vrot.lane.b32.xlu1 %v4349_v12, %s3089_s8 }
 0x507   : > { %2214 = vrot.lane.b32.xlu0 %v2198_v21, %s3087_s21 }
 0x508   : > { %2166 = vrot.lane.b32.xlu1 %v2150_v40, %s3086_s20 }
 0x50b   : > { %2343 = vrot.lane.b32.xlu0 %v2150_v40, %s3094_s18  ;;  %v2200_v40 = vrot.slane %v2108_v4, 2 }
 0x50c   : > { %2292 = vrot.lane.b32.xlu1 %v2198_v21, %s3095_s15 }
 0x50d   : > { %v2201_v34 = vsel %vm1132_vm12, %v2199_v32, %v2200_v40 }
 0x50f   : > { %2370 = vrot.lane.b32.xlu0 %v2198_v21, %s3096_s29 }
 0x510   : > { %2319 = vrot.lane.b32.xlu1 %v2109_v33, %s3093_s17 }
 0x513   : > { %2241 = vrot.lane.b32.xlu0 %v2109_v33, %s3089_s8 }
 0x514   : > { %2263 = vrot.lane.b32.xlu1 %v2147_v1, %s3091_s14 }
 0x517   : > { %2164 = vrot.lane.b32.xlu0 %v2147_v1, %s3086_s20 }
 0x518   : > { %2290 = vrot.lane.b32.xlu1 %v2195_v26, %s3095_s15 }
 0x51b   : > { %2212 = vrot.lane.b32.xlu0 %v2195_v26, %s3087_s21 }
 0x51c   : > { %2317 = vrot.lane.b32.xlu1 %v4404_v41, %s3093_s17 }
 0x51e   : > { %v2308_v3 = vpop.permute.xlu0 %2307  ;;  %v2230_v30 = vpop.permute.xlu1 %2229 }
 0x51f   : > { %2341 = vrot.lane.b32.xlu0 %v2147_v1, %s3094_s18 }
 0x520   : > { %2296 = vrot.lane.b32.xlu1 %v2281_v37, %s3095_s15 }
 0x522   : > { %v2159_v21 = vpop.permute.xlu0 %2158  ;;  %v2228_v24 = vpop.permute.xlu1 %2227 }
 0x523   : > { %2368 = vrot.lane.b32.xlu0 %v2195_v26, %s3096_s29 }
 0x524   : > { %2347 = vrot.lane.b32.xlu1 %v2254_v20, %s3094_s18 }
 0x526   : > { %v2207_v23 = vpop.permute.xlu0 %2206  ;;  %v2258_v11 = vpop.permute.xlu1 %2257 }
 0x527   : > { %2239 = vrot.lane.b32.xlu0 %v4404_v41, %s3089_s8  ;;  %s3028_s8 = scalar_lea.vmem %s3027_s23, 2048 }
 0x528   : > { %2374 = vrot.lane.b32.xlu1 %v2281_v37, %s3096_s29 }
 0x52a   : > { %v2285_v31 = vpop.permute.xlu0 %2284 }
 0x52b   : > { %2269 = vrot.lane.b32.xlu0 %v2254_v20, %s3091_s14 }
 0x52c   : > { %2345 = vrot.lane.b32.xlu1 %v2153_v10, %s3094_s18 }
 0x52e   : > { %v2336_v33 = vpop.permute.xlu0 %2335 }
 0x52f   : > { %2168 = vrot.lane.b32.xlu0 %v2153_v10, %s3086_s20 }
 0x530   : > { %2372 = vrot.lane.b32.xlu1 %v2201_v34, %s3096_s29 }
 0x532   : > { %v2363_v14 = vpop.permute.xlu0 %2362 }
 0x533   : > { %2216 = vrot.lane.b32.xlu0 %v2201_v34, %s3087_s21  ;;  %s269_s21 = sand.u32 1, %s3074_s25  }
 0x534   : > { %2376 = vrot.lane.b32.xlu1 %v2361_v44, %s3096_s29  ;;  %s2696_s17 = sshll.u32 %s269_s21, 6 }
 0x535   : > { %s4536_s18 = scalar_lea.vmem [#allocation5], %s2696_s17 }
 0x537   : > { %2267 = vrot.lane.b32.xlu0 %v2153_v10, %s3091_s14 }
 0x53b   : > { %2294 = vrot.lane.b32.xlu0 %v2201_v34, %s3095_s15  ;;  %s2750_s15 = sshll.u32 %s3160_s28, 10  ;;  %s4577_s28 = scalar_lea.sflag [#allocation6], %s269_s21 }
 0x53c   : > { %s4563_s19 = scalar_lea.hbm %s4625_s7, %s2750_s15 }
 0x53f   : > { %2364 = vrot.lane.b32.xlu0 %v4345_v5, %s3096_s29  ;;  %s2630_s29 = sshll.u32 %s4536_s18, 4  ;;  %s4569_s29 = int_to_ptr.vmem [resolvable:$true] %s2630_s29 }
 0x540   : > { %s3022_s22 = scalar_lea.vmem %s4569_s29, 1024  ;;  %p3029_p0 = scmp.lt.s32.totalorder %s4569_s29, %s3027_s23 }
 0x541   : > { %p3023_p11 = scmp.ne.s32.totalorder %s4569_s29, %s3022_s22  ;;  %p3030_p1 = scmp.lt.s32.totalorder %s3028_s8, %s3022_s22 }
 0x542   : > { %v4438_v45 = vpop.permute.xlu1 %2233 }
 0x543   : > { %p3024_p12 = pnand %p3023_p11, %p3177_p5  ;;  %p3031_p2 = por %p3030_p1, %p3029_p0 }
 0x544   : > { %v2232_v29 = vpop.permute.xlu0 %2231 }
 0x545   : > { %p3025_p13 = pneg %p3024_p12 }
 0x546   : > { %v2312_v13 = vpop.permute.xlu1 %2311 }
 0x547   : > { %p3032_p3 = pnand %p3031_p2, %p3025_p13 }
 0x548   : > { %v2310_v56 = vpop.permute.xlu0 %2309 }
 0x54a   : > { %v2157_v62 = vpop.permute.xlu1 %2156 }
 0x54b   : > { %v2387_v1 = vsel %vm277_vm3, %v4278_v53, %v2157_v62  ;;  %v2402_v53 = vsel %vm730_vm8, %v2394_v38, %v2228_v24 }
 0x54c   : > { %v2262_v49 = vpop.permute.xlu0 %2261 }
 0x54e   : > { %v2205_v7 = vpop.permute.xlu1 %2204 }
 0x54f   : > { %v2395_v52 = vsel %vm712_vm6, %v2387_v1, %v2205_v7 }
 0x550   : > { %v2403_v26 = vsel %vm730_vm8, %v2395_v52, %v2230_v30  ;;  %v2289_v10 = vpop.permute.xlu0 %2288 }
 0x551   : > { %v2411_v5 = vsel %vm748_vm10, %v2403_v26, %v2258_v11  ;;  %v2388_v11 = vsel %vm277_vm3, %v4270_v36, %v2159_v21 }
 0x552   : > { %v2256_v15 = vpop.permute.xlu1 %2255  ;;  %v2419_v16 = vsel %vm1373_vm13, %v2411_v5, %v2285_v31 }
 0x553   : > { %v2427_v37 = vsel %vm1382_vm14, %v2419_v16, %v2310_v56  ;;  %v2410_v27 = vsel %vm748_vm10, %v2402_v53, %v2256_v15 }
 0x556   : > { %v2283_v20 = vpop.permute.xlu1 %2282 }
 0x557   : > { %v2418_v43 = vsel %vm1373_vm13, %v2410_v27, %v2283_v20 }
 0x558   : > { %v2426_v4 = vsel %vm1382_vm14, %v2418_v43, %v2308_v3 }
 0x559   : > { %v2434_v35 = vsel %vm1391_vm15, %v2426_v4, %v2336_v33  ;;  %v2396_v33 = vsel %vm712_vm6, %v2388_v11, %v2207_v23 }
 0x55a   : > { %v2163_v22 = vpop.permute.xlu1 %2162  ;;  %v2442_v42 = vsel %vm1400_vm1, %v2434_v35, %v2363_v14  ;;  %v2404_v14 = vsel %vm730_vm8, %v2396_v33, %v2232_v29 }
 0x55b   : > { %2938 = vmatprep.mubr.msk.f32.mxu0 %vm1422_vm2, %v2442_v42  ;;  %v2390_v43 = vsel %vm277_vm3, %v4294_v8, %v2163_v22 }
 0x55e   : > { %v2211_v32 = vpop.permute.xlu1 %2210 }
 0x55f   : > { %v2398_v35 = vsel %vm712_vm6, %v2390_v43, %v2211_v32 }
 0x561   : > { %v2238_v40 = vpop.permute.xlu0 %2237 }
 0x562   : > { %v2340_v2 = vpop.permute.xlu1 %2339 }
 0x565   : > { %v2316_v51 = vpop.permute.xlu0 %2315 }
 0x566   : > { %v2367_v34 = vpop.permute.xlu1 %2366 }
 0x569   : > { %v2260_v44 = vpop.permute.xlu0 %2259 }
 0x56a   : > { %v2161_v30 = vpop.permute.xlu1 %2160  ;;  %v2412_v1 = vsel %vm748_vm10, %v2404_v14, %v2260_v44 }
 0x56b   : > { %v2389_v27 = vsel %vm277_vm3, %v4298_v17, %v2161_v30 }
 0x56d   : > { %v2338_v24 = vpop.permute.xlu0 %2337 }
 0x56e   : > { %v4458_v31 = vsel %vm1391_vm15, %v2427_v37, %v2338_v24  ;;  %v2209_v3 = vpop.permute.xlu1 %2208 }
 0x571   : > { %v2314_v62 = vpop.permute.xlu0 %2313 }
 0x572   : > { %v2287_v7 = vpop.permute.xlu1 %2286 }
 0x573   : > { %v2420_v46 = vsel %vm1373_vm13, %v2412_v1, %v2287_v7 }
 0x574   : > { %v2428_v52 = vsel %vm1382_vm14, %v2420_v46, %v2312_v13  ;;  %v2397_v13 = vsel %vm712_vm6, %v2389_v27, %v2209_v3 }
 0x575   : > { %v2266_v26 = vpop.permute.xlu0 %2265  ;;  %v2436_v56 = vsel %vm1391_vm15, %v2428_v52, %v2340_v2  ;;  %v2405_v42 = vsel %vm730_vm8, %v2397_v13, %v4438_v45 }
 0x576   : > { %v2236_v5 = vpop.permute.xlu1 %2235  ;;  %v2444_v38 = vsel %vm1400_vm1, %v2436_v56, %v2367_v34  ;;  %v2413_v24 = vsel %vm748_vm10, %v2405_v42, %v2262_v49 }
 0x577   : > { %2941 = vmatprep.mubr.msk.f32.mxu1 %vm1422_vm2, %v2444_v38  ;;  %v2406_v2 = vsel %vm730_vm8, %v2398_v35, %v2236_v5  ;;  %v2421_v3 = vsel %vm1373_vm13, %v2413_v24, %v2289_v10 }
 0x578   : > { %v2429_v32 = vsel %vm1382_vm14, %v2421_v3, %v2314_v62 }
 0x579   : > { %v2215_v36 = vpop.permute.xlu0 %2214 }
 0x57a   : > { %v2167_v21 = vpop.permute.xlu1 %2166 }
 0x57d   : > { %v2344_v23 = vpop.permute.xlu0 %2343 }
 0x57e   : > { %v2293_v29 = vpop.permute.xlu1 %2292 }
 0x581   : > { %v2371_v15 = vpop.permute.xlu0 %2370 }
 0x582   : > { %v2320_v16 = vpop.permute.xlu1 %2319 }
 0x585   : > { %v2242_v37 = vpop.permute.xlu0 %2241 }
 0x586   : > { %v2264_v53 = vpop.permute.xlu1 %2263 }
 0x587   : > { %v2414_v34 = vsel %vm748_vm10, %v2406_v2, %v2264_v53 }
 0x589   : > { %v2165_v20 = vpop.permute.xlu0 %2164 }
 0x58a   : > { %v2291_v4 = vpop.permute.xlu1 %2290  ;;  %v2391_v45 = vsel %vm277_vm3, %v4349_v12, %v2165_v20 }
 0x58b   : > { %v2422_v17 = vsel %vm1373_vm13, %v2414_v34, %v2291_v4 }
 0x58c   : > { %v2430_v8 = vsel %vm1382_vm14, %v2422_v17, %v2316_v51 }
 0x58d   : > { %v2213_v44 = vpop.permute.xlu0 %2212  ;;  %v2438_v33 = vsel %vm1391_vm15, %v2430_v8, %v2344_v23 }
 0x58e   : > { %v2318_v30 = vpop.permute.xlu1 %2317  ;;  %v2399_v14 = vsel %vm712_vm6, %v2391_v45, %v2213_v44  ;;  %v2446_v10 = vsel %vm1400_vm1, %v2438_v33, %v2371_v15 }
 0x58f   : > { %v2407_v51 = vsel %vm730_vm8, %v2399_v14, %v2238_v40 }
 0x590   : > { %v2415_v52 = vsel %vm748_vm10, %v2407_v51, %v2266_v26 }
 0x591   : > { %v2342_v22 = vpop.permute.xlu0 %2341  ;;  %v2423_v5 = vsel %vm1373_vm13, %v2415_v52, %v2293_v29  ;;  %v2392_v29 = vsel %vm277_vm3, %v4330_v25, %v2167_v21 }
 0x592   : > { %v2297_v11 = vpop.permute.xlu1 %2296  ;;  %v2437_v49 = vsel %vm1391_vm15, %v2429_v32, %v2342_v22  ;;  %v2431_v23 = vsel %vm1382_vm14, %v2423_v5, %v2318_v30  ;;  %v2400_v2 = vsel %vm712_vm6, %v2392_v29, %v2215_v36 }
 0x595   : > { %v2369_v1 = vpop.permute.xlu0 %2368 }
 0x596   : > { %v2445_v7 = vsel %vm1400_vm1, %v2437_v49, %v2369_v1  ;;  %v2348_v46 = vpop.permute.xlu1 %2347 }
 0x597   : > { %2942 = vmatmul.mubr.msk.f32.vlgmr.msra.gmra.mxu1 %vm1422_vm2, %v2445_v7 }
 0x598   : > { %2944 = vmatprep.mubr.msk.f32.mxu1 %vm1422_vm2, %v2446_v10 }
 0x599   : > { %v2240_v62 = vpop.permute.xlu0 %2239 }
 0x59a   : > { %v2375_v12 = vpop.permute.xlu1 %2374  ;;  %v2408_v34 = vsel %vm730_vm8, %v2400_v2, %v2240_v62 }
 0x59d   : > { %v2270_v56 = vpop.permute.xlu0 %2269 }
 0x59e   : > { %v2346_v38 = vpop.permute.xlu1 %2345 }
 0x59f   : > { %v2439_v27 = vsel %vm1391_vm15, %v2431_v23, %v2346_v38 }
 0x5a1   : > { %v2169_v53 = vpop.permute.xlu0 %2168 }
 0x5a2   : > { %v2373_v13 = vpop.permute.xlu1 %2372  ;;  %v2393_v40 = vsel %vm277_vm3, %v4404_v41, %v2169_v53 }
 0x5a3   : > { %v2447_v15 = vsel %vm1400_vm1, %v2439_v27, %v2373_v13 }
 0x5a4   : > { %2945 = vmatmul.mubr.msk.f32.gmra.mxu1 %vm1422_vm2, %v2447_v15 }
 0x5a5   : > { %v2217_v20 = vpop.permute.xlu0 %2216 }
 0x5a6   : > { %v2401_v26 = vsel %vm712_vm6, %v2393_v40, %v2217_v20  ;;  %v2377_v21 = vpop.permute.xlu1 %2376 }
 0x5a7   : > { %v2409_v43 = vsel %vm730_vm8, %v2401_v26, %v2242_v37 }
 0x5a8   : > { %v2417_v4 = vsel %vm748_vm10, %v2409_v43, %v2270_v56 }
 0x5a9   : > { %v2268_v35 = vpop.permute.xlu0 %2267  ;;  %v2425_v42 = vsel %vm1373_vm13, %v2417_v4, %v2297_v11 }
 0x5aa   : > { %v2433_v41 = vsel %vm1382_vm14, %v2425_v42, %v4414_v57  ;;  %v2416_v44 = vsel %vm748_vm10, %v2408_v34, %v2268_v35 }
 0x5ab   : > { %v2441_v25 = vsel %vm1391_vm15, %v2433_v41, %v4423_v55  ;;  %v2736_v55 = vld [vmem:[%s4624_s6 + $0x4] ss:$0 sm:$0xff] }
 0x5ac   : > { %v2449_v8 = vsel %vm1400_vm1, %v2441_v25, %v2377_v21 }
 0x5ad   : > { %v2295_v24 = vpop.permute.xlu0 %2294 }
 0x5ae   : > { %v2424_v37 = vsel %vm1373_vm13, %v2416_v44, %v2295_v24 }
 0x5af   : > { %v2432_v17 = vsel %vm1382_vm14, %v2424_v37, %v2320_v16 }
 0x5b0   : > { %v2440_v36 = vsel %vm1391_vm15, %v2432_v17, %v2348_v46 }
 0x5b1   : > { %v2365_v30 = vpop.permute.xlu0 %2364  ;;  %v2448_v3 = vsel %vm1400_vm1, %v2440_v36, %v2375_v12 }
 0x5b2   : > { %v2443_v57 = vsel %vm1400_vm1, %v4458_v31, %v2365_v30  ;;  %2947 = vmatprep.mubr.msk.f32.mxu1 %vm1422_vm2, %v2448_v3 }
 0x5b3   : > { %2939 = vmatmul.mubr.msk.f32.vlgmr.msra.gmra.mxu0 %vm1422_vm2, %v2443_v57  ;;  %2948 = vmatmul.mubr.msk.f32.gmra.mxu1 %vm1422_vm2, %v2449_v8 }
 0x657   : > { %v2943_v16 = vpop.f32.mrf.mxu1 }
 0x658   : > { %v2569_v22 = vadd.f32 %v2943_v16, %v2736_v55 }
 0x659   : > { %v2563_v11 = vpop.f32.mrf.mxu1 }
 0x65a   : > { %v2595_v32 = vadd.f32 %v2569_v22, %v1563_v59  ;;  %v2564_v31 = vadd.f32 %v2736_v55, %v2563_v11 }
 0x65c   : > { %v2603_v45 = vmax.f32 %v2595_v32, 0.0  ;;  %v2594_v33 = vadd.f32 %v2564_v31, %v1562_v28 }
 0x65e   : > { %2611 = vst.msk [vmem:[%s4536_s18 + $0x18] sm:$0xff] %vm277_vm3, %v2603_v45  ;;  %v2602_v14 = vmax.f32 %v2594_v33, 0.0 }
 0x660   : > { %2610 = vst.msk [vmem:[%s4536_s18 + $0x10] sm:$0xff] %vm277_vm3, %v2602_v14 }
 0x664   : > { %v2946_v49 = vpop.f32.mrf.mxu1 }
 0x665   : > { %v2579_v1 = vadd.f32 %v2946_v49, %v2736_v55 }
 0x666   : > { %v2573_v63 = vpop.f32.mrf.mxu1 }
 0x667   : > { %v2597_v59 = vadd.f32 %v2579_v1, %v1565_v50  ;;  %v2574_v7 = vadd.f32 %v2736_v55, %v2573_v63 }
 0x669   : > { %v2605_v9 = vmax.f32 %v2597_v59, 0.0  ;;  %v2596_v28 = vadd.f32 %v2574_v7, %v1564_v39 }
 0x66b   : > { %2613 = vst.msk [vmem:[%s4536_s18 + $0x28] sm:$0xff] %vm277_vm3, %v2605_v9  ;;  %v2604_v46 = vmax.f32 %v2596_v28, 0.0 }
 0x66d   : > { %2612 = vst.msk [vmem:[%s4536_s18 + $0x20] sm:$0xff] %vm277_vm3, %v2604_v46 }
 0x673   : > { %v2940_v10 = vpop.f32.mrf.mxu0  ;;  %v2949_v51 = vpop.f32.mrf.mxu1 }
 0x674   : > { %v2559_v62 = vadd.f32 %v2940_v10, %v2736_v55  ;;  %v2589_v12 = vadd.f32 %v2949_v51, %v2736_v55 }
 0x675   : > { %v2553_v54 = vpop.f32.mrf.mxu0  ;;  %v2583_v50 = vpop.f32.mrf.mxu1 }
 0x676   : > { %v2593_v52 = vadd.f32 %v2559_v62, %v1561_v60  ;;  %v2599_v61 = vadd.f32 %v2589_v12, %v1567_v6  ;;  %v2554_v39 = vadd.f32 %v2736_v55, %v2553_v54  ;;  %v2584_v56 = vadd.f32 %v2736_v55, %v2583_v50 }
 0x678   : > { %v2601_v5 = vmax.f32 %v2593_v52, 0.0  ;;  %v2607_v38 = vmax.f32 %v2599_v61, 0.0  ;;  %v2592_v23 = vadd.f32 %v2554_v39, %v1560_v18  ;;  %v2598_v48 = vadd.f32 %v2584_v56, %v1566_v58 }
 0x67a   : > { %2609 = vst.msk [vmem:[%s4536_s18 + $0x8] sm:$0xff] %vm277_vm3, %v2601_v5  ;;  %2615 = vst.msk [vmem:[%s4536_s18 + $0x38] sm:$0xff] %vm277_vm3, %v2607_v38  ;;  %v2600_v60 = vmax.f32 %v2592_v23, 0.0  ;;  %v2606_v19 = vmax.f32 %v2598_v48, 0.0 }
 0x67c   : > { %2608 = vst.msk [vmem:[%s4536_s18] sm:$0xff] %vm277_vm3, %v2600_v60  ;;  %2614 = vst.msk [vmem:[%s4536_s18 + $0x30] sm:$0xff] %vm277_vm3, %v2606_v19 }
 0x67d   : > { %3035 = shalt.err (!%p3032_p3)
}
 0x67e   : > { %s3036_s21 = scalar_lea.hbm %s4563_s19, 1024  ;;  %s3040_s18 = scalar_lea.hbm %s4625_s7, 2048 }
 0x67f   : > { %p3037_p4 = scmp.ne.s32.totalorder %s4563_s19, %s3036_s21  ;;  %p3041_p9 = scmp.lt.s32.totalorder %s4563_s19, %s4625_s7 }
 0x680   : > { %p3042_p10 = scmp.lt.s32.totalorder %s3040_s18, %s3036_s21 }
 0x681   : > { %p3038_p7 = pnand %p3037_p4, %p3177_p5 }
 0x682   : > { %p3043_p11 = por %p3042_p10, %p3041_p9 }
 0x683   : > { %p3039_p8 = pneg %p3038_p7 }
 0x685   : > { %p3044_p12 = pnand %p3043_p11, %p3039_p8 }
 0x687   : > { %3047 = shalt.err (!%p3044_p12)
}
 0x688   : > { %s3098_s13 = smov 128  }
 0x689   : > { %2969 = dma.vmem_to_hbm [thread:$0]  (%p3177_p5), %s4569_s29, 1024, %s4563_s19, %s4577_s28, %s3098_s13, %s3098_s13, %s3086_s20  }
 0x68a PF: > { %p2975_p13 = scmp.ge.s32.totalorder %s3082_s27, 2  ;;  %s2645_s22 = sand.u32 1, %s3070_s24  }
 0x68b   : > { %s2646_s16 = scalar_lea.sflag [#allocation6], %s2645_s22 }
 0x68c   : > { %p2972_p0 = pnand %p2975_p13, %p3181_p6 }
 0x68e   : > { %p2973_p1 = pneg %p2972_p0 }
 0x690   : > { %3065 = dma.done.wait (%p2973_p1), %s2646_s16, 1024  }
 0x691   : > { %3067 = vsyncadd (%p2973_p1), %s2646_s16, 4294966272  ;;  %p17_p2 = scmp.ge.s32.totalorder %s3164_s30, 4   ;;  %s4628_s24 = smov %s3074_s25 }
 0x692   : > { %s4629_s25 = smov %s3078_s26  ;;  %s4630_s26 = smov %s3175_s10 }
 0x693   : > { %s4631_s27 = smov %s3164_s30  ;;  %19 = sbr.rel (!%p17_p2) target bundleno = 3 (0x3), region = 86 }
 0x698   :  { %2651 = vsyncpa [#allocation6], 1 }
 0x699   :  { %2653 = vsyncpa [#allocation6 + $0x1], 1 }

</bundles_post_ra>
